<compile_context>
chip_gen: v6e
topology: v6e:2x2x1
jax: 0.10.0
libtpu: 0.0.40
codegen_flags: <defaults>
</compile_context>

<pallas_src>
import math

import jax
import jax.numpy as jnp
from jax.experimental import pallas as pl
from jax.experimental.pallas import tpu as pltpu

# ---------------- config (small synthetic shapes) ----------------
B, S, D, H, DFF = 2, 8, 32, 4, 64          # batch, seq, d_model, heads, d_ff
DK = D // H
EPS = 1e-6                                  # LayerNorm eps (matches module)


def _layernorm(x, a, b):
    """Matches the PyTorch LayerNorm in the module: mean / std over last dim,
    std is *unbiased* (torch.std default), denominator is (std + eps)."""
    mean = jnp.mean(x, axis=-1, keepdims=True)
    var = jnp.sum((x - mean) ** 2, axis=-1, keepdims=True) / (x.shape[-1] - 1)
    inv = pl.reciprocal(jnp.sqrt(var) + EPS, approx=False)
    return a * (x - mean) * inv + b


def encoder_layer_kernel(x_ref, bias_ref, wqkv_ref, bqkv_ref, wo_ref,
                         w1_ref, b1_ref, w2_ref, vec_ref, o_ref):
    x = x_ref[...]                      # (B*S, D)
    vec = vec_ref[...]                  # (6, D): ln1a, ln1b, ln2a, ln2b, bo, b2
    ln1a, ln1b = vec[0:1, :], vec[1:2, :]
    ln2a, ln2b = vec[2:3, :], vec[3:4, :]
    bo,   b2   = vec[4:5, :], vec[5:6, :]

    # ---------------- sublayer 0:  x + self_attn(LN(x)) ----------------
    xn = _layernorm(x, ln1a, ln1b)
    # fused QKV projection: one (B*S, D) x (D, 3D) matmul (scale pre-folded)
    qkv = jnp.dot(xn, wqkv_ref[...],
                  preferred_element_type=jnp.float32) + bqkv_ref[...]   # (B*S, 3D)

    rows = []
    for b in range(B):                  # static unroll (B = 2)
        r0 = b * S
        qkv_b = qkv[r0:r0 + S, :]       # (S, 3D)
        bias_b = bias_ref[b]            # (S, S) additive mask bias (0 / -1e9)
        attn_b = jnp.zeros((S, D), jnp.float32)
        for h in range(H):              # static unroll (H = 4)
            c = h * DK
            qh = qkv_b[:, c:c + DK]                       # (S, DK), pre-scaled
            kh = qkv_b[:, D + c:D + c + DK]
            vh = qkv_b[:, 2 * D + c:2 * D + c + DK]
            s = jnp.dot(qh, kh.T, preferred_element_type=jnp.float32) + bias_b
            m = jnp.max(s, axis=-1, keepdims=True)
            e = jnp.exp(s - m)
            inv = pl.reciprocal(jnp.sum(e, axis=-1, keepdims=True), approx=False)
            p = e * inv
            pv = jnp.dot(p, vh, preferred_element_type=jnp.float32)      # (S, DK)
            # accumulate through the matching rows of Wo: no lane concat
            attn_b = attn_b + jnp.dot(pv, wo_ref[c:c + DK, :],
                                      preferred_element_type=jnp.float32)
        rows.append(x[r0:r0 + S, :] + attn_b)
    x1 = jnp.concatenate(rows, axis=0) + bo               # residual, (B*S, D)

    # ---------------- sublayer 1:  x + FFN(LN(x)) -----------------------
    xn2 = _layernorm(x1, ln2a, ln2b)
    hid = jnp.maximum(
        jnp.dot(xn2, w1_ref[...], preferred_element_type=jnp.float32)
        + b1_ref[...], 0.0)
    ff = jnp.dot(hid, w2_ref[...], preferred_element_type=jnp.float32) + b2
    o_ref[...] = x1 + ff


def encoder_layer(x, mask, params):
    (ln1a, ln1b, wq, bq, wk, bk, wv, bv, wo, bo,
     ln2a, ln2b, w1, b1, w2, b2) = params

    # ---- one-time parameter fusion / folding (constants, outside kernel) ----
    scale = 1.0 / math.sqrt(DK)
    wqkv = jnp.concatenate([wq * scale, wk, wv], axis=1)             # (D, 3D)
    bqkv = jnp.concatenate([bq * scale, bk, bv], axis=1)             # (1, 3D)
    vec = jnp.concatenate([ln1a, ln1b, ln2a, ln2b, bo, b2], axis=0)  # (6, D)
    bias = (mask - 1.0) * 1e9                # additive mask bias: 0 kept, -1e9 masked
    x2 = x.reshape(B * S, D)                 # M = 16 rows for every projection

    vspec = pl.BlockSpec(memory_space=pltpu.MemorySpace.VMEM)        # whole array in VMEM
    out = pl.pallas_call(
        encoder_layer_kernel,
        out_shape=jax.ShapeDtypeStruct((B * S, D), jnp.float32),
        in_specs=[vspec] * 9,
        out_specs=vspec,
    )(x2, bias, wqkv, bqkv, wo, w1, b1, w2, vec)
    return out.reshape(B, S, D)


# ---------------- pure-JAX reference for correctness check ----------------
def reference(x, mask, params):
    (ln1a, ln1b, wq, bq, wk, bk, wv, bv, wo, bo,
     ln2a, ln2b, w1, b1, w2, b2) = params

    def ln(x, a, b):
        mean = x.mean(-1, keepdims=True)
        var = jnp.sum((x - mean) ** 2, -1, keepdims=True) / (x.shape[-1] - 1)
        return a * (x - mean) / (jnp.sqrt(var) + EPS) + b

    xn = ln(x, ln1a, ln1b)
    q = xn @ wq + bq
    k = xn @ wk + bk
    v = xn @ wv + bv
    qh = q.reshape(B, S, H, DK).transpose(0, 2, 1, 3)
    kh = k.reshape(B, S, H, DK).transpose(0, 2, 1, 3)
    vh = v.reshape(B, S, H, DK).transpose(0, 2, 1, 3)
    scores = (qh @ kh.transpose(0, 1, 3, 2)) / math.sqrt(DK)
    scores = jnp.where(mask[:, None] == 0, -1e9, scores)
    p = jax.nn.softmax(scores, axis=-1)
    attn = (p @ vh).transpose(0, 2, 1, 3).reshape(B, S, D)
    x1 = x + (attn @ wo + bo)

    xn2 = ln(x1, ln2a, ln2b)
    ff = jnp.maximum(xn2 @ w1 + b1, 0.0) @ w2 + b2
    return x1 + ff


if __name__ == "__main__":
    key = jax.random.PRNGKey(0)
    ks = jax.random.split(key, 16)

    ln1a = jnp.ones((1, D), jnp.float32)
    ln1b = jnp.zeros((1, D), jnp.float32)
    ln2a = jnp.ones((1, D), jnp.float32)
    ln2b = jnp.zeros((1, D), jnp.float32)
    wq = 0.05 * jax.random.normal(ks[0], (D, D), jnp.float32)
    wk = 0.05 * jax.random.normal(ks[1], (D, D), jnp.float32)
    wv = 0.05 * jax.random.normal(ks[2], (D, D), jnp.float32)
    wo = 0.05 * jax.random.normal(ks[3], (D, D), jnp.float32)
    bq = 0.01 * jax.random.normal(ks[4], (1, D), jnp.float32)
    bk = 0.01 * jax.random.normal(ks[5], (1, D), jnp.float32)
    bv = 0.01 * jax.random.normal(ks[6], (1, D), jnp.float32)
    bo = 0.01 * jax.random.normal(ks[7], (1, D), jnp.float32)
    w1 = 0.05 * jax.random.normal(ks[8], (D, DFF), jnp.float32)
    b1 = 0.01 * jax.random.normal(ks[9], (1, DFF), jnp.float32)
    w2 = 0.05 * jax.random.normal(ks[10], (DFF, D), jnp.float32)
    b2 = 0.01 * jax.random.normal(ks[11], (1, D), jnp.float32)

    params = (ln1a, ln1b, wq, bq, wk, bk, wv, bv, wo, bo,
              ln2a, ln2b, w1, b1, w2, b2)

    # inputs
    x = jax.random.normal(ks[12], (B, S, D), jnp.float32)
    # padding-style mask: batch 1 has its last two key positions masked out
    mask = jnp.ones((B, S, S), jnp.float32)
    mask = mask.at[1, :, S - 2:].set(0.0)

    out = encoder_layer(x, mask, params)
    out = jax.block_until_ready(out)

    ref = reference(x, mask, params)
    assert out.shape == (B, S, D)
    assert jnp.allclose(out, ref, rtol=1e-4, atol=1e-4), (
        float(jnp.max(jnp.abs(out - ref))))

    print("KERNEL_OK")
</pallas_src>

<mosaic_0001>
module attributes {stable_mosaic.version = 11 : i64} {
  func.func @encoder_layer_kernel(%arg0: memref<16x32xf32, #tpu.memory_space<vmem>>, %arg1: memref<2x8x8xf32, #tpu.memory_space<vmem>>, %arg2: memref<32x96xf32, #tpu.memory_space<vmem>>, %arg3: memref<1x96xf32, #tpu.memory_space<vmem>>, %arg4: memref<32x32xf32, #tpu.memory_space<vmem>>, %arg5: memref<32x64xf32, #tpu.memory_space<vmem>>, %arg6: memref<1x64xf32, #tpu.memory_space<vmem>>, %arg7: memref<64x32xf32, #tpu.memory_space<vmem>>, %arg8: memref<6x32xf32, #tpu.memory_space<vmem>>, %arg9: memref<16x32xf32, #tpu.memory_space<vmem>>) attributes {dimension_semantics = [], scalar_prefetch = 0 : i64, scratch_operands = 0 : i64, tpu.core_type = #tpu.core_type<tc>} {
    %c0 = arith.constant 0 : index
    %c0_0 = arith.constant 0 : index
    %0 = vector.load %arg0[%c0, %c0_0] : memref<16x32xf32, #tpu.memory_space<vmem>>, vector<16x32xf32>
    %c0_1 = arith.constant 0 : index
    %c0_2 = arith.constant 0 : index
    %1 = vector.load %arg8[%c0_1, %c0_2] : memref<6x32xf32, #tpu.memory_space<vmem>>, vector<6x32xf32>
    %2 = vector.extract_strided_slice %1 {offsets = [0, 0], sizes = [1, 32], strides = [1, 1]} : vector<6x32xf32> to vector<1x32xf32>
    %3 = vector.extract_strided_slice %1 {offsets = [1, 0], sizes = [1, 32], strides = [1, 1]} : vector<6x32xf32> to vector<1x32xf32>
    %4 = vector.extract_strided_slice %1 {offsets = [2, 0], sizes = [1, 32], strides = [1, 1]} : vector<6x32xf32> to vector<1x32xf32>
    %5 = vector.extract_strided_slice %1 {offsets = [3, 0], sizes = [1, 32], strides = [1, 1]} : vector<6x32xf32> to vector<1x32xf32>
    %6 = vector.extract_strided_slice %1 {offsets = [4, 0], sizes = [1, 32], strides = [1, 1]} : vector<6x32xf32> to vector<1x32xf32>
    %7 = vector.extract_strided_slice %1 {offsets = [5, 0], sizes = [1, 32], strides = [1, 1]} : vector<6x32xf32> to vector<1x32xf32>
    %cst = arith.constant dense<0.000000e+00> : vector<16xf32>
    %8 = vector.multi_reduction <add>, %0, %cst [1] : vector<16x32xf32> to vector<16xf32>
    %9 = vector.shape_cast %8 : vector<16xf32> to vector<16x1xf32>
    %cst_3 = arith.constant 3.200000e+01 : f32
    %10 = vector.broadcast %cst_3 : f32 to vector<16x1xf32>
    %11 = arith.divf %9, %10 : vector<16x1xf32>
    %12 = vector.broadcast %11 : vector<16x1xf32> to vector<16x32xf32>
    %13 = arith.subf %0, %12 : vector<16x32xf32>
    %14 = arith.mulf %13, %13 : vector<16x32xf32>
    %cst_4 = arith.constant dense<0.000000e+00> : vector<16xf32>
    %15 = vector.multi_reduction <add>, %14, %cst_4 [1] : vector<16x32xf32> to vector<16xf32>
    %16 = vector.shape_cast %15 : vector<16xf32> to vector<16x1xf32>
    %cst_5 = arith.constant 3.100000e+01 : f32
    %17 = vector.broadcast %cst_5 : f32 to vector<16x1xf32>
    %18 = arith.divf %16, %17 : vector<16x1xf32>
    %19 = math.sqrt %18 : vector<16x1xf32>
    %cst_6 = arith.constant 9.99999997E-7 : f32
    %20 = vector.broadcast %cst_6 : f32 to vector<16x1xf32>
    %21 = arith.addf %19, %20 : vector<16x1xf32>
    %22 = tpu.reciprocal %21 : vector<16x1xf32> -> vector<16x1xf32>
    %23 = vector.broadcast %11 : vector<16x1xf32> to vector<16x32xf32>
    %24 = arith.subf %0, %23 : vector<16x32xf32>
    %25 = vector.broadcast %2 : vector<1x32xf32> to vector<16x32xf32>
    %26 = arith.mulf %25, %24 : vector<16x32xf32>
    %27 = vector.broadcast %22 : vector<16x1xf32> to vector<16x32xf32>
    %28 = arith.mulf %26, %27 : vector<16x32xf32>
    %29 = vector.broadcast %3 : vector<1x32xf32> to vector<16x32xf32>
    %30 = arith.addf %28, %29 : vector<16x32xf32>
    %c0_7 = arith.constant 0 : index
    %c0_8 = arith.constant 0 : index
    %31 = vector.load %arg2[%c0_7, %c0_8] : memref<32x96xf32, #tpu.memory_space<vmem>>, vector<32x96xf32>
    %cst_9 = arith.constant dense<0.000000e+00> : vector<16x96xf32>
    %32 = tpu.matmul %30, %31, %cst_9 {dimension_numbers = #tpu.dot_dimension_numbers<[1], [0], [0], [1], [0, 0, 1, 1], [], []>} : vector<16x32xf32>, vector<32x96xf32>, vector<16x96xf32> -> vector<16x96xf32>
    %c0_10 = arith.constant 0 : index
    %c0_11 = arith.constant 0 : index
    %33 = vector.load %arg3[%c0_10, %c0_11] : memref<1x96xf32, #tpu.memory_space<vmem>>, vector<1x96xf32>
    %34 = vector.broadcast %33 : vector<1x96xf32> to vector<16x96xf32>
    %35 = arith.addf %32, %34 : vector<16x96xf32>
    %36 = vector.extract_strided_slice %35 {offsets = [0, 0], sizes = [8, 96], strides = [1, 1]} : vector<16x96xf32> to vector<8x96xf32>
    %c0_12 = arith.constant 0 : index
    %c0_13 = arith.constant 0 : index
    %c0_14 = arith.constant 0 : index
    %37 = vector.load %arg1[%c0_12, %c0_13, %c0_14] : memref<2x8x8xf32, #tpu.memory_space<vmem>>, vector<1x8x8xf32>
    %38 = vector.shape_cast %37 : vector<1x8x8xf32> to vector<8x8xf32>
    %cst_15 = arith.constant 0.000000e+00 : f32
    %39 = vector.broadcast %cst_15 : f32 to vector<8x32xf32>
    %40 = vector.extract_strided_slice %36 {offsets = [0, 0], sizes = [8, 8], strides = [1, 1]} : vector<8x96xf32> to vector<8x8xf32>
    %41 = vector.extract_strided_slice %36 {offsets = [0, 32], sizes = [8, 8], strides = [1, 1]} : vector<8x96xf32> to vector<8x8xf32>
    %42 = vector.extract_strided_slice %36 {offsets = [0, 64], sizes = [8, 8], strides = [1, 1]} : vector<8x96xf32> to vector<8x8xf32>
    %43 = tpu.transpose %41, [1, 0] : vector<8x8xf32> -> vector<8x8xf32>
    %cst_16 = arith.constant dense<0.000000e+00> : vector<8x8xf32>
    %44 = tpu.matmul %40, %43, %cst_16 {dimension_numbers = #tpu.dot_dimension_numbers<[1], [0], [0], [1], [0, 0, 1, 1], [], []>} : vector<8x8xf32>, vector<8x8xf32>, vector<8x8xf32> -> vector<8x8xf32>
    %45 = arith.addf %44, %38 : vector<8x8xf32>
    %cst_17 = arith.constant dense<0xFF800000> : vector<8xf32>
    %46 = vector.multi_reduction <maximumf>, %45, %cst_17 [1] : vector<8x8xf32> to vector<8xf32>
    %47 = vector.shape_cast %46 : vector<8xf32> to vector<8x1xf32>
    %48 = vector.broadcast %47 : vector<8x1xf32> to vector<8x8xf32>
    %49 = arith.subf %45, %48 : vector<8x8xf32>
    %50 = math.exp %49 : vector<8x8xf32>
    %cst_18 = arith.constant dense<0.000000e+00> : vector<8xf32>
    %51 = vector.multi_reduction <add>, %50, %cst_18 [1] : vector<8x8xf32> to vector<8xf32>
    %52 = vector.shape_cast %51 : vector<8xf32> to vector<8x1xf32>
    %53 = tpu.reciprocal %52 : vector<8x1xf32> -> vector<8x1xf32>
    %54 = vector.broadcast %53 : vector<8x1xf32> to vector<8x8xf32>
    %55 = arith.mulf %50, %54 : vector<8x8xf32>
    %cst_19 = arith.constant dense<0.000000e+00> : vector<8x8xf32>
    %56 = tpu.matmul %55, %42, %cst_19 {dimension_numbers = #tpu.dot_dimension_numbers<[1], [0], [0], [1], [0, 0, 1, 1], [], []>} : vector<8x8xf32>, vector<8x8xf32>, vector<8x8xf32> -> vector<8x8xf32>
    %c0_20 = arith.constant 0 : index
    %c0_21 = arith.constant 0 : index
    %57 = vector.load %arg4[%c0_20, %c0_21] : memref<32x32xf32, #tpu.memory_space<vmem>>, vector<8x32xf32>
    %cst_22 = arith.constant dense<0.000000e+00> : vector<8x32xf32>
    %58 = tpu.matmul %56, %57, %cst_22 {dimension_numbers = #tpu.dot_dimension_numbers<[1], [0], [0], [1], [0, 0, 1, 1], [], []>} : vector<8x8xf32>, vector<8x32xf32>, vector<8x32xf32> -> vector<8x32xf32>
    %59 = arith.addf %39, %58 : vector<8x32xf32>
    %60 = vector.extract_strided_slice %36 {offsets = [0, 8], sizes = [8, 8], strides = [1, 1]} : vector<8x96xf32> to vector<8x8xf32>
    %61 = vector.extract_strided_slice %36 {offsets = [0, 40], sizes = [8, 8], strides = [1, 1]} : vector<8x96xf32> to vector<8x8xf32>
    %62 = vector.extract_strided_slice %36 {offsets = [0, 72], sizes = [8, 8], strides = [1, 1]} : vector<8x96xf32> to vector<8x8xf32>
    %63 = tpu.transpose %61, [1, 0] : vector<8x8xf32> -> vector<8x8xf32>
    %cst_23 = arith.constant dense<0.000000e+00> : vector<8x8xf32>
    %64 = tpu.matmul %60, %63, %cst_23 {dimension_numbers = #tpu.dot_dimension_numbers<[1], [0], [0], [1], [0, 0, 1, 1], [], []>} : vector<8x8xf32>, vector<8x8xf32>, vector<8x8xf32> -> vector<8x8xf32>
    %65 = arith.addf %64, %38 : vector<8x8xf32>
    %cst_24 = arith.constant dense<0xFF800000> : vector<8xf32>
    %66 = vector.multi_reduction <maximumf>, %65, %cst_24 [1] : vector<8x8xf32> to vector<8xf32>
    %67 = vector.shape_cast %66 : vector<8xf32> to vector<8x1xf32>
    %68 = vector.broadcast %67 : vector<8x1xf32> to vector<8x8xf32>
    %69 = arith.subf %65, %68 : vector<8x8xf32>
    %70 = math.exp %69 : vector<8x8xf32>
    %cst_25 = arith.constant dense<0.000000e+00> : vector<8xf32>
    %71 = vector.multi_reduction <add>, %70, %cst_25 [1] : vector<8x8xf32> to vector<8xf32>
    %72 = vector.shape_cast %71 : vector<8xf32> to vector<8x1xf32>
    %73 = tpu.reciprocal %72 : vector<8x1xf32> -> vector<8x1xf32>
    %74 = vector.broadcast %73 : vector<8x1xf32> to vector<8x8xf32>
    %75 = arith.mulf %70, %74 : vector<8x8xf32>
    %cst_26 = arith.constant dense<0.000000e+00> : vector<8x8xf32>
    %76 = tpu.matmul %75, %62, %cst_26 {dimension_numbers = #tpu.dot_dimension_numbers<[1], [0], [0], [1], [0, 0, 1, 1], [], []>} : vector<8x8xf32>, vector<8x8xf32>, vector<8x8xf32> -> vector<8x8xf32>
    %c8 = arith.constant 8 : index
    %c0_27 = arith.constant 0 : index
    %77 = vector.load %arg4[%c8, %c0_27] : memref<32x32xf32, #tpu.memory_space<vmem>>, vector<8x32xf32>
    %cst_28 = arith.constant dense<0.000000e+00> : vector<8x32xf32>
    %78 = tpu.matmul %76, %77, %cst_28 {dimension_numbers = #tpu.dot_dimension_numbers<[1], [0], [0], [1], [0, 0, 1, 1], [], []>} : vector<8x8xf32>, vector<8x32xf32>, vector<8x32xf32> -> vector<8x32xf32>
    %79 = arith.addf %59, %78 : vector<8x32xf32>
    %80 = vector.extract_strided_slice %36 {offsets = [0, 16], sizes = [8, 8], strides = [1, 1]} : vector<8x96xf32> to vector<8x8xf32>
    %81 = vector.extract_strided_slice %36 {offsets = [0, 48], sizes = [8, 8], strides = [1, 1]} : vector<8x96xf32> to vector<8x8xf32>
    %82 = vector.extract_strided_slice %36 {offsets = [0, 80], sizes = [8, 8], strides = [1, 1]} : vector<8x96xf32> to vector<8x8xf32>
    %83 = tpu.transpose %81, [1, 0] : vector<8x8xf32> -> vector<8x8xf32>
    %cst_29 = arith.constant dense<0.000000e+00> : vector<8x8xf32>
    %84 = tpu.matmul %80, %83, %cst_29 {dimension_numbers = #tpu.dot_dimension_numbers<[1], [0], [0], [1], [0, 0, 1, 1], [], []>} : vector<8x8xf32>, vector<8x8xf32>, vector<8x8xf32> -> vector<8x8xf32>
    %85 = arith.addf %84, %38 : vector<8x8xf32>
    %cst_30 = arith.constant dense<0xFF800000> : vector<8xf32>
    %86 = vector.multi_reduction <maximumf>, %85, %cst_30 [1] : vector<8x8xf32> to vector<8xf32>
    %87 = vector.shape_cast %86 : vector<8xf32> to vector<8x1xf32>
    %88 = vector.broadcast %87 : vector<8x1xf32> to vector<8x8xf32>
    %89 = arith.subf %85, %88 : vector<8x8xf32>
    %90 = math.exp %89 : vector<8x8xf32>
    %cst_31 = arith.constant dense<0.000000e+00> : vector<8xf32>
    %91 = vector.multi_reduction <add>, %90, %cst_31 [1] : vector<8x8xf32> to vector<8xf32>
    %92 = vector.shape_cast %91 : vector<8xf32> to vector<8x1xf32>
    %93 = tpu.reciprocal %92 : vector<8x1xf32> -> vector<8x1xf32>
    %94 = vector.broadcast %93 : vector<8x1xf32> to vector<8x8xf32>
    %95 = arith.mulf %90, %94 : vector<8x8xf32>
    %cst_32 = arith.constant dense<0.000000e+00> : vector<8x8xf32>
    %96 = tpu.matmul %95, %82, %cst_32 {dimension_numbers = #tpu.dot_dimension_numbers<[1], [0], [0], [1], [0, 0, 1, 1], [], []>} : vector<8x8xf32>, vector<8x8xf32>, vector<8x8xf32> -> vector<8x8xf32>
    %c16 = arith.constant 16 : index
    %c0_33 = arith.constant 0 : index
    %97 = vector.load %arg4[%c16, %c0_33] : memref<32x32xf32, #tpu.memory_space<vmem>>, vector<8x32xf32>
    %cst_34 = arith.constant dense<0.000000e+00> : vector<8x32xf32>
    %98 = tpu.matmul %96, %97, %cst_34 {dimension_numbers = #tpu.dot_dimension_numbers<[1], [0], [0], [1], [0, 0, 1, 1], [], []>} : vector<8x8xf32>, vector<8x32xf32>, vector<8x32xf32> -> vector<8x32xf32>
    %99 = arith.addf %79, %98 : vector<8x32xf32>
    %100 = vector.extract_strided_slice %36 {offsets = [0, 24], sizes = [8, 8], strides = [1, 1]} : vector<8x96xf32> to vector<8x8xf32>
    %101 = vector.extract_strided_slice %36 {offsets = [0, 56], sizes = [8, 8], strides = [1, 1]} : vector<8x96xf32> to vector<8x8xf32>
    %102 = vector.extract_strided_slice %36 {offsets = [0, 88], sizes = [8, 8], strides = [1, 1]} : vector<8x96xf32> to vector<8x8xf32>
    %103 = tpu.transpose %101, [1, 0] : vector<8x8xf32> -> vector<8x8xf32>
    %cst_35 = arith.constant dense<0.000000e+00> : vector<8x8xf32>
    %104 = tpu.matmul %100, %103, %cst_35 {dimension_numbers = #tpu.dot_dimension_numbers<[1], [0], [0], [1], [0, 0, 1, 1], [], []>} : vector<8x8xf32>, vector<8x8xf32>, vector<8x8xf32> -> vector<8x8xf32>
    %105 = arith.addf %104, %38 : vector<8x8xf32>
    %cst_36 = arith.constant dense<0xFF800000> : vector<8xf32>
    %106 = vector.multi_reduction <maximumf>, %105, %cst_36 [1] : vector<8x8xf32> to vector<8xf32>
    %107 = vector.shape_cast %106 : vector<8xf32> to vector<8x1xf32>
    %108 = vector.broadcast %107 : vector<8x1xf32> to vector<8x8xf32>
    %109 = arith.subf %105, %108 : vector<8x8xf32>
    %110 = math.exp %109 : vector<8x8xf32>
    %cst_37 = arith.constant dense<0.000000e+00> : vector<8xf32>
    %111 = vector.multi_reduction <add>, %110, %cst_37 [1] : vector<8x8xf32> to vector<8xf32>
    %112 = vector.shape_cast %111 : vector<8xf32> to vector<8x1xf32>
    %113 = tpu.reciprocal %112 : vector<8x1xf32> -> vector<8x1xf32>
    %114 = vector.broadcast %113 : vector<8x1xf32> to vector<8x8xf32>
    %115 = arith.mulf %110, %114 : vector<8x8xf32>
    %cst_38 = arith.constant dense<0.000000e+00> : vector<8x8xf32>
    %116 = tpu.matmul %115, %102, %cst_38 {dimension_numbers = #tpu.dot_dimension_numbers<[1], [0], [0], [1], [0, 0, 1, 1], [], []>} : vector<8x8xf32>, vector<8x8xf32>, vector<8x8xf32> -> vector<8x8xf32>
    %c24 = arith.constant 24 : index
    %c0_39 = arith.constant 0 : index
    %117 = vector.load %arg4[%c24, %c0_39] : memref<32x32xf32, #tpu.memory_space<vmem>>, vector<8x32xf32>
    %cst_40 = arith.constant dense<0.000000e+00> : vector<8x32xf32>
    %118 = tpu.matmul %116, %117, %cst_40 {dimension_numbers = #tpu.dot_dimension_numbers<[1], [0], [0], [1], [0, 0, 1, 1], [], []>} : vector<8x8xf32>, vector<8x32xf32>, vector<8x32xf32> -> vector<8x32xf32>
    %119 = arith.addf %99, %118 : vector<8x32xf32>
    %120 = vector.extract_strided_slice %0 {offsets = [0, 0], sizes = [8, 32], strides = [1, 1]} : vector<16x32xf32> to vector<8x32xf32>
    %121 = arith.addf %120, %119 : vector<8x32xf32>
    %122 = vector.extract_strided_slice %35 {offsets = [8, 0], sizes = [8, 96], strides = [1, 1]} : vector<16x96xf32> to vector<8x96xf32>
    %c1 = arith.constant 1 : index
    %c0_41 = arith.constant 0 : index
    %c0_42 = arith.constant 0 : index
    %123 = vector.load %arg1[%c1, %c0_41, %c0_42] : memref<2x8x8xf32, #tpu.memory_space<vmem>>, vector<1x8x8xf32>
    %124 = vector.shape_cast %123 : vector<1x8x8xf32> to vector<8x8xf32>
    %cst_43 = arith.constant 0.000000e+00 : f32
    %125 = vector.broadcast %cst_43 : f32 to vector<8x32xf32>
    %126 = vector.extract_strided_slice %122 {offsets = [0, 0], sizes = [8, 8], strides = [1, 1]} : vector<8x96xf32> to vector<8x8xf32>
    %127 = vector.extract_strided_slice %122 {offsets = [0, 32], sizes = [8, 8], strides = [1, 1]} : vector<8x96xf32> to vector<8x8xf32>
    %128 = vector.extract_strided_slice %122 {offsets = [0, 64], sizes = [8, 8], strides = [1, 1]} : vector<8x96xf32> to vector<8x8xf32>
    %129 = tpu.transpose %127, [1, 0] : vector<8x8xf32> -> vector<8x8xf32>
    %cst_44 = arith.constant dense<0.000000e+00> : vector<8x8xf32>
    %130 = tpu.matmul %126, %129, %cst_44 {dimension_numbers = #tpu.dot_dimension_numbers<[1], [0], [0], [1], [0, 0, 1, 1], [], []>} : vector<8x8xf32>, vector<8x8xf32>, vector<8x8xf32> -> vector<8x8xf32>
    %131 = arith.addf %130, %124 : vector<8x8xf32>
    %cst_45 = arith.constant dense<0xFF800000> : vector<8xf32>
    %132 = vector.multi_reduction <maximumf>, %131, %cst_45 [1] : vector<8x8xf32> to vector<8xf32>
    %133 = vector.shape_cast %132 : vector<8xf32> to vector<8x1xf32>
    %134 = vector.broadcast %133 : vector<8x1xf32> to vector<8x8xf32>
    %135 = arith.subf %131, %134 : vector<8x8xf32>
    %136 = math.exp %135 : vector<8x8xf32>
    %cst_46 = arith.constant dense<0.000000e+00> : vector<8xf32>
    %137 = vector.multi_reduction <add>, %136, %cst_46 [1] : vector<8x8xf32> to vector<8xf32>
    %138 = vector.shape_cast %137 : vector<8xf32> to vector<8x1xf32>
    %139 = tpu.reciprocal %138 : vector<8x1xf32> -> vector<8x1xf32>
    %140 = vector.broadcast %139 : vector<8x1xf32> to vector<8x8xf32>
    %141 = arith.mulf %136, %140 : vector<8x8xf32>
    %cst_47 = arith.constant dense<0.000000e+00> : vector<8x8xf32>
    %142 = tpu.matmul %141, %128, %cst_47 {dimension_numbers = #tpu.dot_dimension_numbers<[1], [0], [0], [1], [0, 0, 1, 1], [], []>} : vector<8x8xf32>, vector<8x8xf32>, vector<8x8xf32> -> vector<8x8xf32>
    %c0_48 = arith.constant 0 : index
    %c0_49 = arith.constant 0 : index
    %143 = vector.load %arg4[%c0_48, %c0_49] : memref<32x32xf32, #tpu.memory_space<vmem>>, vector<8x32xf32>
    %cst_50 = arith.constant dense<0.000000e+00> : vector<8x32xf32>
    %144 = tpu.matmul %142, %143, %cst_50 {dimension_numbers = #tpu.dot_dimension_numbers<[1], [0], [0], [1], [0, 0, 1, 1], [], []>} : vector<8x8xf32>, vector<8x32xf32>, vector<8x32xf32> -> vector<8x32xf32>
    %145 = arith.addf %125, %144 : vector<8x32xf32>
    %146 = vector.extract_strided_slice %122 {offsets = [0, 8], sizes = [8, 8], strides = [1, 1]} : vector<8x96xf32> to vector<8x8xf32>
    %147 = vector.extract_strided_slice %122 {offsets = [0, 40], sizes = [8, 8], strides = [1, 1]} : vector<8x96xf32> to vector<8x8xf32>
    %148 = vector.extract_strided_slice %122 {offsets = [0, 72], sizes = [8, 8], strides = [1, 1]} : vector<8x96xf32> to vector<8x8xf32>
    %149 = tpu.transpose %147, [1, 0] : vector<8x8xf32> -> vector<8x8xf32>
    %cst_51 = arith.constant dense<0.000000e+00> : vector<8x8xf32>
    %150 = tpu.matmul %146, %149, %cst_51 {dimension_numbers = #tpu.dot_dimension_numbers<[1], [0], [0], [1], [0, 0, 1, 1], [], []>} : vector<8x8xf32>, vector<8x8xf32>, vector<8x8xf32> -> vector<8x8xf32>
    %151 = arith.addf %150, %124 : vector<8x8xf32>
    %cst_52 = arith.constant dense<0xFF800000> : vector<8xf32>
    %152 = vector.multi_reduction <maximumf>, %151, %cst_52 [1] : vector<8x8xf32> to vector<8xf32>
    %153 = vector.shape_cast %152 : vector<8xf32> to vector<8x1xf32>
    %154 = vector.broadcast %153 : vector<8x1xf32> to vector<8x8xf32>
    %155 = arith.subf %151, %154 : vector<8x8xf32>
    %156 = math.exp %155 : vector<8x8xf32>
    %cst_53 = arith.constant dense<0.000000e+00> : vector<8xf32>
    %157 = vector.multi_reduction <add>, %156, %cst_53 [1] : vector<8x8xf32> to vector<8xf32>
    %158 = vector.shape_cast %157 : vector<8xf32> to vector<8x1xf32>
    %159 = tpu.reciprocal %158 : vector<8x1xf32> -> vector<8x1xf32>
    %160 = vector.broadcast %159 : vector<8x1xf32> to vector<8x8xf32>
    %161 = arith.mulf %156, %160 : vector<8x8xf32>
    %cst_54 = arith.constant dense<0.000000e+00> : vector<8x8xf32>
    %162 = tpu.matmul %161, %148, %cst_54 {dimension_numbers = #tpu.dot_dimension_numbers<[1], [0], [0], [1], [0, 0, 1, 1], [], []>} : vector<8x8xf32>, vector<8x8xf32>, vector<8x8xf32> -> vector<8x8xf32>
    %c8_55 = arith.constant 8 : index
    %c0_56 = arith.constant 0 : index
    %163 = vector.load %arg4[%c8_55, %c0_56] : memref<32x32xf32, #tpu.memory_space<vmem>>, vector<8x32xf32>
    %cst_57 = arith.constant dense<0.000000e+00> : vector<8x32xf32>
    %164 = tpu.matmul %162, %163, %cst_57 {dimension_numbers = #tpu.dot_dimension_numbers<[1], [0], [0], [1], [0, 0, 1, 1], [], []>} : vector<8x8xf32>, vector<8x32xf32>, vector<8x32xf32> -> vector<8x32xf32>
    %165 = arith.addf %145, %164 : vector<8x32xf32>
    %166 = vector.extract_strided_slice %122 {offsets = [0, 16], sizes = [8, 8], strides = [1, 1]} : vector<8x96xf32> to vector<8x8xf32>
    %167 = vector.extract_strided_slice %122 {offsets = [0, 48], sizes = [8, 8], strides = [1, 1]} : vector<8x96xf32> to vector<8x8xf32>
    %168 = vector.extract_strided_slice %122 {offsets = [0, 80], sizes = [8, 8], strides = [1, 1]} : vector<8x96xf32> to vector<8x8xf32>
    %169 = tpu.transpose %167, [1, 0] : vector<8x8xf32> -> vector<8x8xf32>
    %cst_58 = arith.constant dense<0.000000e+00> : vector<8x8xf32>
    %170 = tpu.matmul %166, %169, %cst_58 {dimension_numbers = #tpu.dot_dimension_numbers<[1], [0], [0], [1], [0, 0, 1, 1], [], []>} : vector<8x8xf32>, vector<8x8xf32>, vector<8x8xf32> -> vector<8x8xf32>
    %171 = arith.addf %170, %124 : vector<8x8xf32>
    %cst_59 = arith.constant dense<0xFF800000> : vector<8xf32>
    %172 = vector.multi_reduction <maximumf>, %171, %cst_59 [1] : vector<8x8xf32> to vector<8xf32>
    %173 = vector.shape_cast %172 : vector<8xf32> to vector<8x1xf32>
    %174 = vector.broadcast %173 : vector<8x1xf32> to vector<8x8xf32>
    %175 = arith.subf %171, %174 : vector<8x8xf32>
    %176 = math.exp %175 : vector<8x8xf32>
    %cst_60 = arith.constant dense<0.000000e+00> : vector<8xf32>
    %177 = vector.multi_reduction <add>, %176, %cst_60 [1] : vector<8x8xf32> to vector<8xf32>
    %178 = vector.shape_cast %177 : vector<8xf32> to vector<8x1xf32>
    %179 = tpu.reciprocal %178 : vector<8x1xf32> -> vector<8x1xf32>
    %180 = vector.broadcast %179 : vector<8x1xf32> to vector<8x8xf32>
    %181 = arith.mulf %176, %180 : vector<8x8xf32>
    %cst_61 = arith.constant dense<0.000000e+00> : vector<8x8xf32>
    %182 = tpu.matmul %181, %168, %cst_61 {dimension_numbers = #tpu.dot_dimension_numbers<[1], [0], [0], [1], [0, 0, 1, 1], [], []>} : vector<8x8xf32>, vector<8x8xf32>, vector<8x8xf32> -> vector<8x8xf32>
    %c16_62 = arith.constant 16 : index
    %c0_63 = arith.constant 0 : index
    %183 = vector.load %arg4[%c16_62, %c0_63] : memref<32x32xf32, #tpu.memory_space<vmem>>, vector<8x32xf32>
    %cst_64 = arith.constant dense<0.000000e+00> : vector<8x32xf32>
    %184 = tpu.matmul %182, %183, %cst_64 {dimension_numbers = #tpu.dot_dimension_numbers<[1], [0], [0], [1], [0, 0, 1, 1], [], []>} : vector<8x8xf32>, vector<8x32xf32>, vector<8x32xf32> -> vector<8x32xf32>
    %185 = arith.addf %165, %184 : vector<8x32xf32>
    %186 = vector.extract_strided_slice %122 {offsets = [0, 24], sizes = [8, 8], strides = [1, 1]} : vector<8x96xf32> to vector<8x8xf32>
    %187 = vector.extract_strided_slice %122 {offsets = [0, 56], sizes = [8, 8], strides = [1, 1]} : vector<8x96xf32> to vector<8x8xf32>
    %188 = vector.extract_strided_slice %122 {offsets = [0, 88], sizes = [8, 8], strides = [1, 1]} : vector<8x96xf32> to vector<8x8xf32>
    %189 = tpu.transpose %187, [1, 0] : vector<8x8xf32> -> vector<8x8xf32>
    %cst_65 = arith.constant dense<0.000000e+00> : vector<8x8xf32>
    %190 = tpu.matmul %186, %189, %cst_65 {dimension_numbers = #tpu.dot_dimension_numbers<[1], [0], [0], [1], [0, 0, 1, 1], [], []>} : vector<8x8xf32>, vector<8x8xf32>, vector<8x8xf32> -> vector<8x8xf32>
    %191 = arith.addf %190, %124 : vector<8x8xf32>
    %cst_66 = arith.constant dense<0xFF800000> : vector<8xf32>
    %192 = vector.multi_reduction <maximumf>, %191, %cst_66 [1] : vector<8x8xf32> to vector<8xf32>
    %193 = vector.shape_cast %192 : vector<8xf32> to vector<8x1xf32>
    %194 = vector.broadcast %193 : vector<8x1xf32> to vector<8x8xf32>
    %195 = arith.subf %191, %194 : vector<8x8xf32>
    %196 = math.exp %195 : vector<8x8xf32>
    %cst_67 = arith.constant dense<0.000000e+00> : vector<8xf32>
    %197 = vector.multi_reduction <add>, %196, %cst_67 [1] : vector<8x8xf32> to vector<8xf32>
    %198 = vector.shape_cast %197 : vector<8xf32> to vector<8x1xf32>
    %199 = tpu.reciprocal %198 : vector<8x1xf32> -> vector<8x1xf32>
    %200 = vector.broadcast %199 : vector<8x1xf32> to vector<8x8xf32>
    %201 = arith.mulf %196, %200 : vector<8x8xf32>
    %cst_68 = arith.constant dense<0.000000e+00> : vector<8x8xf32>
    %202 = tpu.matmul %201, %188, %cst_68 {dimension_numbers = #tpu.dot_dimension_numbers<[1], [0], [0], [1], [0, 0, 1, 1], [], []>} : vector<8x8xf32>, vector<8x8xf32>, vector<8x8xf32> -> vector<8x8xf32>
    %c24_69 = arith.constant 24 : index
    %c0_70 = arith.constant 0 : index
    %203 = vector.load %arg4[%c24_69, %c0_70] : memref<32x32xf32, #tpu.memory_space<vmem>>, vector<8x32xf32>
    %cst_71 = arith.constant dense<0.000000e+00> : vector<8x32xf32>
    %204 = tpu.matmul %202, %203, %cst_71 {dimension_numbers = #tpu.dot_dimension_numbers<[1], [0], [0], [1], [0, 0, 1, 1], [], []>} : vector<8x8xf32>, vector<8x32xf32>, vector<8x32xf32> -> vector<8x32xf32>
    %205 = arith.addf %185, %204 : vector<8x32xf32>
    %206 = vector.extract_strided_slice %0 {offsets = [8, 0], sizes = [8, 32], strides = [1, 1]} : vector<16x32xf32> to vector<8x32xf32>
    %207 = arith.addf %206, %205 : vector<8x32xf32>
    %208 = tpu.concatenate %121, %207 in 0 : vector<8x32xf32>, vector<8x32xf32> -> vector<16x32xf32>
    %209 = vector.broadcast %6 : vector<1x32xf32> to vector<16x32xf32>
    %210 = arith.addf %208, %209 : vector<16x32xf32>
    %cst_72 = arith.constant dense<0.000000e+00> : vector<16xf32>
    %211 = vector.multi_reduction <add>, %210, %cst_72 [1] : vector<16x32xf32> to vector<16xf32>
    %212 = vector.shape_cast %211 : vector<16xf32> to vector<16x1xf32>
    %cst_73 = arith.constant 3.200000e+01 : f32
    %213 = vector.broadcast %cst_73 : f32 to vector<16x1xf32>
    %214 = arith.divf %212, %213 : vector<16x1xf32>
    %215 = vector.broadcast %214 : vector<16x1xf32> to vector<16x32xf32>
    %216 = arith.subf %210, %215 : vector<16x32xf32>
    %217 = arith.mulf %216, %216 : vector<16x32xf32>
    %cst_74 = arith.constant dense<0.000000e+00> : vector<16xf32>
    %218 = vector.multi_reduction <add>, %217, %cst_74 [1] : vector<16x32xf32> to vector<16xf32>
    %219 = vector.shape_cast %218 : vector<16xf32> to vector<16x1xf32>
    %cst_75 = arith.constant 3.100000e+01 : f32
    %220 = vector.broadcast %cst_75 : f32 to vector<16x1xf32>
    %221 = arith.divf %219, %220 : vector<16x1xf32>
    %222 = math.sqrt %221 : vector<16x1xf32>
    %cst_76 = arith.constant 9.99999997E-7 : f32
    %223 = vector.broadcast %cst_76 : f32 to vector<16x1xf32>
    %224 = arith.addf %222, %223 : vector<16x1xf32>
    %225 = tpu.reciprocal %224 : vector<16x1xf32> -> vector<16x1xf32>
    %226 = vector.broadcast %214 : vector<16x1xf32> to vector<16x32xf32>
    %227 = arith.subf %210, %226 : vector<16x32xf32>
    %228 = vector.broadcast %4 : vector<1x32xf32> to vector<16x32xf32>
    %229 = arith.mulf %228, %227 : vector<16x32xf32>
    %230 = vector.broadcast %225 : vector<16x1xf32> to vector<16x32xf32>
    %231 = arith.mulf %229, %230 : vector<16x32xf32>
    %232 = vector.broadcast %5 : vector<1x32xf32> to vector<16x32xf32>
    %233 = arith.addf %231, %232 : vector<16x32xf32>
    %c0_77 = arith.constant 0 : index
    %c0_78 = arith.constant 0 : index
    %234 = vector.load %arg5[%c0_77, %c0_78] : memref<32x64xf32, #tpu.memory_space<vmem>>, vector<32x64xf32>
    %cst_79 = arith.constant dense<0.000000e+00> : vector<16x64xf32>
    %235 = tpu.matmul %233, %234, %cst_79 {dimension_numbers = #tpu.dot_dimension_numbers<[1], [0], [0], [1], [0, 0, 1, 1], [], []>} : vector<16x32xf32>, vector<32x64xf32>, vector<16x64xf32> -> vector<16x64xf32>
    %c0_80 = arith.constant 0 : index
    %c0_81 = arith.constant 0 : index
    %236 = vector.load %arg6[%c0_80, %c0_81] : memref<1x64xf32, #tpu.memory_space<vmem>>, vector<1x64xf32>
    %237 = vector.broadcast %236 : vector<1x64xf32> to vector<16x64xf32>
    %238 = arith.addf %235, %237 : vector<16x64xf32>
    %cst_82 = arith.constant 0.000000e+00 : f32
    %239 = vector.broadcast %cst_82 : f32 to vector<16x64xf32>
    %240 = arith.maximumf %238, %239 : vector<16x64xf32>
    %c0_83 = arith.constant 0 : index
    %c0_84 = arith.constant 0 : index
    %241 = vector.load %arg7[%c0_83, %c0_84] : memref<64x32xf32, #tpu.memory_space<vmem>>, vector<64x32xf32>
    %cst_85 = arith.constant dense<0.000000e+00> : vector<16x32xf32>
    %242 = tpu.matmul %240, %241, %cst_85 {dimension_numbers = #tpu.dot_dimension_numbers<[1], [0], [0], [1], [0, 0, 1, 1], [], []>} : vector<16x64xf32>, vector<64x32xf32>, vector<16x32xf32> -> vector<16x32xf32>
    %243 = vector.broadcast %7 : vector<1x32xf32> to vector<16x32xf32>
    %244 = arith.addf %242, %243 : vector<16x32xf32>
    %245 = arith.addf %210, %244 : vector<16x32xf32>
    %c0_86 = arith.constant 0 : index
    %c0_87 = arith.constant 0 : index
    %246 = vector.load %arg9[%c0_86, %c0_87] : memref<16x32xf32, #tpu.memory_space<vmem>>, vector<16x32xf32>
    tpu.vector_store %arg9[%c0_86, %c0_87], %245 {strides = array<i32>} : memref<16x32xf32, #tpu.memory_space<vmem>>, vector<16x32xf32>,
    return
  }
}

</mosaic_0001>

<bundles_post_ra>
// kernel: tpu_custom_call.1
= control target key start
LH: loop header
LB: loop body
LE: loop exit
PB: predicated region body
PF: predicated region fallthrough
CT: control target
= control target key end

     0   :  { %14 = vsyncpa [#allocation3], 0  ;;  %s3207_s0 = inlined_call_operand.hbm [shape: f32[16,32], index: 0, kind: input, shape index: {}]   ;;  %s3208_s1 = inlined_call_operand.hbm [shape: f32[2,8,8], index: 1, kind: input, shape index: {}]   ;;  %s3209_s2 = inlined_call_operand.vmem [shape: f32[32,96], index: 2, kind: input, shape index: {}]   ;;  %s3210_s3 = inlined_call_operand.vmem [shape: f32[1,96], index: 3, kind: input, shape index: {}]   ;;  %s3211_s4 = inlined_call_operand.vmem [shape: f32[32,32], index: 4, kind: input, shape index: {}]   ;;  %s3212_s5 = inlined_call_operand.vmem [shape: f32[32,64], index: 5, kind: input, shape index: {}]   ;;  %s3213_s6 = inlined_call_operand.vmem [shape: f32[1,64], index: 6, kind: input, shape index: {}]   ;;  %s3214_s7 = inlined_call_operand.vmem [shape: f32[64,32], index: 7, kind: input, shape index: {}]   ;;  %s3215_s8 = inlined_call_operand.vmem [shape: f32[6,32], index: 8, kind: input, shape index: {}]   ;;  %s3216_s9 = inlined_call_operand.hbm [shape: f32[16,32], index: 9, kind: output, shape index: {}]  }
   0x1   :  { %15 = vsyncpa [#allocation6], 0 }
   0x2   :  { %16 = vsyncpa [#allocation4], 0  ;;  %s2798_s30 = smov [#allocation2]  }
   0x3   :  { %s22_s10 = sshll.u32 %s2798_s30, 4  ;;  %s23_s10 = int_to_ptr.vmem [resolvable:$true] %s22_s10 }
   0x4   :  { %s2740_s11 = scalar_lea.vmem %s23_s10, 256  ;;  %p2745_p1 = scmp.lt.s32.totalorder %s23_s10, %s23_s10 }
   0x5   :  { %p2741_p0 = scmp.ne.s32.totalorder %s23_s10, %s2740_s11  ;;  %p2746_p2 = scmp.lt.s32.totalorder %s2740_s11, %s2740_s11 }
   0x7   :  { %p2747_p3 = por %p2746_p2, %p2745_p1 }
   0x9   :  { %p2748_p4 = pnand %p2747_p3, %p2741_p0 }
   0xb   :  { %2751 = shalt.err (!%p2748_p4)
}
   0xc   :  { %s2799_s12 = smov 128   ;;  %s2800_s13 = smov 8  }
   0xd   :  { %28 = dma.hbm_to_vmem [thread:$0]  %s3207_s0, 256, %s23_s10, [#allocation3], %s2799_s12, %s2799_s12, %s2800_s13  }
   0xe   :  { %s2801_s16 = smov [#allocation5]  }
   0xf   :  { %s34_s17 = sshll.u32 %s2801_s16, 4  ;;  %s35_s17 = int_to_ptr.vmem [resolvable:$true] %s34_s17 }
  0x10   :  { %s2760_s18 = scalar_lea.vmem %s35_s17, 256  ;;  %p2765_p6 = scmp.lt.s32.totalorder %s35_s17, %s35_s17 }
  0x11   :  { %p2761_p5 = scmp.ne.s32.totalorder %s35_s17, %s2760_s18  ;;  %p2766_p7 = scmp.lt.s32.totalorder %s2760_s18, %s2760_s18 }
  0x13   :  { %p2767_p8 = por %p2766_p7, %p2765_p6 }
  0x15   :  { %p2768_p9 = pnand %p2767_p8, %p2761_p5 }
  0x17   :  { %2771 = shalt.err (!%p2768_p9)
}
  0x18   :  { %40 = dma.hbm_to_vmem [thread:$0]  %s3208_s1, 256, %s35_s17, [#allocation6], %s2799_s12, %s2799_s12, %s2800_s13  }
  0x19   :  { %2792 = dma.done.wait [#allocation3], 256  }
  0x1a   :  { %2793 = vsyncadd [#allocation3], 4294967040 }
  0x1b   :  { %2794 = dma.done.wait [#allocation6], 256  }
  0x1c   :  { %2795 = vsyncadd [#allocation6], 4294967040  ;;  %vm64_vm0 = vcmask 261120   ;;  %v2878_v0 = vld [vmem:[#allocation2] sm:$0xff]  ;;  %v2880_v1 = vld [vmem:[#allocation2 + $0x8] sm:$0xff]  ;;  %v105_v25 = vlaneseq  ;;  %v2802_v49 = vmov 0.0  }
  0x1d   :  { %v65_v2 = vsel %vm64_vm0, %v2878_v0, 0.0  ;;  %v68_v3 = vsel %vm64_vm0, %v2880_v1, 0.0  ;;  %v122_v14 = vld [vmem:[%s3209_s2 + $0x18] sm:$0xff]  ;;  %v121_v15 = vld [vmem:[%s3209_s2 + $0x10] sm:$0xff]  ;;  %v120_v16 = vld [vmem:[%s3209_s2 + $0x8] sm:$0xff]  ;;  %2521 = vmatprep.subr.mxu1 %v2802_v49  ;;  %vm2803_vm5 = vmmov 0  }
  0x1e   :  { %66 = vadd.xlane.f32.xlu0 %v65_v2  ;;  %2505 = vmatprep.subr.mxu0 %v122_v14  ;;  %v119_v17 = vld [vmem:[%s3209_s2] sm:$0xff]  ;;  %v2902_v32 = vshrl.u32 %v105_v25, 7  ;;  %s2804_s29 = smov 88   ;;  %s2805_s30 = smov 96   ;;  %vm215_vm6 = vcmask 64512   ;;  %v2945_v58 = vld [vmem:[#allocation5] sm:$0xff] }
  0x1f   :  { %2506 = vmatpush3.msra.mxu0 %v122_v14  ;;  %v2908_v37 = vld [vmem:[%s3215_s8] sm:$0x3f]  ;;  %2523 = vmatprep.mubr.msk.f32.mxu1 %vm2803_vm5, %v2802_v49  ;;  %s2806_s10 = smov 120   ;;  %s2808_s11 = smov 80   ;;  %vm2291_vm11 = vcmask 523264  }
  0x20   :  { %2507 = vmatprep.subr.mxu0 %v121_v15  ;;  %v107_v36 = vsub.s32 0, %v2902_v32  ;;  %v115_v39 = vsub.s32 1, %v2902_v32  ;;  %v2395_v50 = vld [vmem:[%s3210_s3] ss:$0 sm:$0xff]  ;;  %s2807_s3 = smov 64   ;;  %s2809_s14 = smov 112  }
  0x21   :  { %2508 = vmatpush3.msra.mxu0 %v121_v15  ;;  %s2810_s15 = smov 56   ;;  %s2811_s20 = smov 72  }
  0x22   :  { %69 = vadd.xlane.f32.xlu0 %v68_v3  ;;  %2509 = vmatprep.subr.mxu0 %v120_v16  ;;  %v108_v38 = vrot.slane %v2908_v37, %v107_v36  ;;  %v116_v41 = vrot.slane %v2908_v37, %v115_v39  ;;  %s2812_s0 = smov 104   ;;  %s2813_s1 = smov 48  }
  0x23   :  { %2510 = vmatpush3.msra.mxu0 %v120_v16  ;;  %s2814_s23 = smov 40  }
  0x24   :  { %2511 = vmatprep.subr.mxu0 %v119_v17 }
  0x25   :  { %2512 = vmatpush3.msra.mxu0 %v119_v17 }
  0x26   :  { %2516 = vmatprep.subr.mxu0 %v2802_v49 }
  0xa7   :  { %v67_v4 = vpop.xlane.xlu0 %66 }
  0xa8   :  { %v72_v5 = vmul.f32 0.03125, %v67_v4 }
  0xaa   :  { %v74_v6 = vsub.f32 %v2878_v0, %v72_v5 }
  0xab   :  { %v70_v7 = vpop.xlane.xlu0 %69 }
  0xac   :  { %v73_v8 = vmul.f32 0.03125, %v70_v7  ;;  %v76_v9 = vmul.f32 %v74_v6, %v74_v6  ;;  %v109_v40 = vmul.f32 %v108_v38, %v74_v6 }
  0xae   :  { %v75_v10 = vsub.f32 %v2880_v1, %v73_v8  ;;  %v78_v11 = vsel %vm64_vm0, %v76_v9, 0.0 }
  0xaf   :  { %79 = vadd.xlane.f32.xlu1 %v78_v11 }
  0xb0   :  { %v77_v12 = vmul.f32 %v75_v10, %v75_v10  ;;  %v110_v44 = vmul.f32 %v108_v38, %v75_v10 }
  0xb2   :  { %v81_v13 = vsel %vm64_vm0, %v77_v12, 0.0 }
  0xb3   :  { %82 = vadd.xlane.f32.xlu1 %v81_v13 }
 0x138   :  { %v80_v18 = vpop.xlane.xlu1 %79 }
 0x139   :  { %v85_v19 = vmul.f32 0.032258064, %v80_v18 }
 0x13b   :  { %2684 = vrsqrt.f32 %v85_v19  ;;  %vm89_vm1 = vcmp.eq.f32.partialorder %v85_v19, inf  ;;  %v92_v24 = vand.u32 2147483648, %v85_v19  ;;  %vm91_vm2 = vcmp.eq.f32.partialorder %v85_v19, 0.0 }
 0x13c   :  { %v83_v20 = vpop.xlane.xlu1 %82 }
 0x13d   :  { %v86_v21 = vmul.f32 0.032258064, %v83_v20 }
 0x13f   :  { %2686 = vrsqrt.f32 %v86_v21  ;;  %vm96_vm3 = vcmp.eq.f32.partialorder %v86_v21, inf  ;;  %v99_v31 = vand.u32 2147483648, %v86_v21  ;;  %vm98_vm4 = vcmp.eq.f32.partialorder %v86_v21, 0.0 }
 0x148   :  { %v2685_v22 = vpop.eup %2684 }
 0x149   :  { %v88_v23 = vmul.f32 %v2685_v22, %v85_v19 }
 0x14b   :  { %v90_v26 = vsel %vm89_vm1, %v85_v19, %v88_v23  ;;  %v2972_v23 = vld [vmem:[%s3211_s4] sm:$0xff] }
 0x14c   :  { %v2687_v27 = vpop.eup %2686  ;;  %v93_v28 = vsel %vm91_vm2, %v92_v24, %v90_v26  ;;  %v2978_v24 = vld [vmem:[%s3211_s4 + $0x8] sm:$0xff] }
 0x14d   :  { %v95_v29 = vmul.f32 %v2687_v27, %v86_v21  ;;  %v101_v30 = vadd.f32 1e-06, %v93_v28 }
 0x14f   :  { %v97_v33 = vsel %vm96_vm3, %v86_v21, %v95_v29  ;;  %2688 = vrcp.f32 %v101_v30 }
 0x150   :  { %v100_v34 = vsel %vm98_vm4, %v99_v31, %v97_v33 }
 0x151   :  { %v102_v35 = vadd.f32 1e-06, %v100_v34 }
 0x153   :  { %2690 = vrcp.f32 %v102_v35 }
 0x15c   :  { %v2689_v42 = vpop.eup %2688 }
 0x15d   :  { %v111_v43 = vmul.f32 %v2689_v42, %v109_v40 }
 0x15f   :  { %v117_v45 = vadd.f32 %v116_v41, %v111_v43 }
 0x160   :  { %v2691_v46 = vpop.eup %2690 }
 0x161   :  { %v112_v47 = vmul.f32 %v2691_v46, %v110_v44  ;;  %2513 = vmatprep.mubr.msk.f32.mxu0 %vm64_vm0, %v117_v45 }
 0x163   :  { %v118_v48 = vadd.f32 %v116_v41, %v112_v47 }
 0x165   :  { %2514 = vmatmul.mubr.msk.f32.vlgmr.msra.gmra.mxu0 %vm64_vm0, %v118_v48 }
 0x166   :  { %2518 = vmatprep.mubr.msk.f32.mxu0 %vm2803_vm5, %v2802_v49 }
 0x225   :  { %v2515_v51 = vpop.f32.mrf.mxu0 }
 0x226   :  { %v2924_v52 = vadd.f32 %v2515_v51, %v2395_v50 }
 0x227   :  { %v202_v53 = vpop.f32.mrf.mxu0 }
 0x228   :  { %v2926_v54 = vadd.f32 %v2395_v50, %v202_v53 }
 0x22a   :  { %380 = vrot.lane.b32.xlu1 %v2926_v54, %s2804_s29  ;;  %213 = vrot.lane.b32.xlu0 %v2926_v54, %s2805_s30 }
 0x22e   :  { %378 = vrot.lane.b32.xlu1 %v2926_v54, %s2806_s10 }
 0x29c   :  { %v214_v55 = vpop.permute.xlu0 %213  ;;  %v381_v56 = vpop.permute.xlu1 %380 }
 0x29d   :  { %2517 = vmatpush3.xpose.msk.msra.mxu0 %vm215_vm6, %v214_v55 }
 0x29e   :  { %2526 = vmatprep.subr.mxu0 %v2802_v49 }
 0x2a0   :  { %2519 = vmatmul.mubr.msk.f32.vlgmr.msra.gmra.mxu0 %vm215_vm6, %v2926_v54  ;;  %v379_v57 = vpop.permute.xlu1 %378 }
 0x2a1   :  { %2527 = vmatpush3.xpose.msk.msra.mxu0 %vm215_vm6, %v381_v56  ;;  %2528 = vmatprep.mubr.msk.f32.mxu0 %vm2803_vm5, %v2802_v49  ;;  %v3019_v56 = vld [vmem:[%s3211_s4 + $0x10] sm:$0xff] }
 0x2a2   :  { %2536 = vmatprep.subr.mxu0 %v2802_v49 }
 0x2a4   :  { %2529 = vmatmul.mubr.msk.f32.vlgmr.msra.gmra.mxu0 %vm215_vm6, %v379_v57 }
 0x2a5   :  { %2538 = vmatprep.mubr.msk.f32.mxu0 %vm2803_vm5, %v2802_v49  ;;  %2537 = vmatpush3.msra.mxu0 %v2978_v24 }
 0x2a6   :  { %2546 = vmatprep.subr.mxu0 %v2802_v49 }
 0x360   :  { %v286_v59 = vpop.f32.mrf.mxu0 }
 0x361   :  { %v287_v60 = vadd.f32 %v286_v59, %v2945_v58 }
 0x362   :  { %v2520_v61 = vpop.f32.mrf.mxu0 }
 0x363   :  { %v290_v62 = vsel %vm215_vm6, %v287_v60, -inf }
 0x364   :  { %291 = vmax.xlane.f32.xlu1 %v290_v62  ;;  %v452_v63 = vpop.f32.mrf.mxu0 }
 0x365   :  { %v453_v2 = vadd.f32 %v452_v63, %v2945_v58 }
 0x366   :  { %v2530_v3 = vpop.f32.mrf.mxu0 }
 0x367   :  { %v456_v4 = vsel %vm215_vm6, %v453_v2, -inf }
 0x368   :  { %457 = vmax.xlane.f32.xlu0 %v456_v4 }
 0x375   :  { %301 = vrot.lane.b32.xlu1 %v2926_v54, %s2807_s3 }
 0x379   :  { %692 = vrot.lane.b32.xlu1 %v2926_v54, %s2808_s11 }
 0x37d   :  { %690 = vrot.lane.b32.xlu1 %v2926_v54, %s2809_s14 }
 0x3ed   :  { %v292_v5 = vpop.xlane.xlu1 %291 }
 0x3ee   :  { %v293_v6 = vsub.f32 %v287_v60, %v292_v5 }
 0x3f0   :  { %v294_v7 = vmul.f32 1.442695, %v293_v6 }
 0x3f1   :  { %v302_v8 = vpop.permute.xlu1 %301  ;;  %v458_v9 = vpop.xlane.xlu0 %457 }
 0x3f2   :  { %2692 = vpow2.f32 %v294_v7  ;;  %v459_v10 = vsub.f32 %v453_v2, %v458_v9  ;;  %2522 = vmatpush3.msra.mxu1 %v302_v8 }
 0x3f3   :  { %2531 = vmatprep.subr.mxu1 %v2802_v49 }
 0x3f4   :  { %v460_v11 = vmul.f32 1.442695, %v459_v10 }
 0x3f5   :  { %v693_v26 = vpop.permute.xlu1 %692 }
 0x3f6   :  { %2694 = vpow2.f32 %v460_v11 }
 0x3f9   :  { %v691_v30 = vpop.permute.xlu1 %690 }
 0x3ff   :  { %v2693_v12 = vpop.eup %2692 }
 0x400   :  { %v296_v13 = vsel %vm215_vm6, %v2693_v12, 0.0 }
 0x401   :  { %297 = vadd.xlane.f32.xlu0 %v296_v13 }
 0x403   :  { %v2695_v14 = vpop.eup %2694 }
 0x404   :  { %v462_v15 = vsel %vm215_vm6, %v2695_v14, 0.0 }
 0x405   :  { %463 = vadd.xlane.f32.xlu0 %v462_v15  ;;  %v3056_v15 = vld [vmem:[%s3211_s4 + $0x18] sm:$0xff] }
 0x41b   :  { %467 = vrot.lane.b32.xlu0 %v2926_v54, %s2810_s15 }
 0x48a   :  { %v298_v16 = vpop.xlane.xlu0 %297 }
 0x48b   :  { %2696 = vrcp.f32 %v298_v16 }
 0x48e   :  { %v464_v17 = vpop.xlane.xlu0 %463 }
 0x48f   :  { %2698 = vrcp.f32 %v464_v17 }
 0x492   :  { %v468_v20 = vpop.permute.xlu0 %467 }
 0x498   :  { %v2697_v18 = vpop.eup %2696 }
 0x499   :  { %v300_v19 = vmul.f32 %v2697_v18, %v2693_v12  ;;  %v3061_v18 = vld [vmem:[#allocation5 + $0x8] sm:$0xff] }
 0x49b   :  { %2524 = vmatmul.mubr.msk.f32.vlgmr.msra.gmra.mxu1 %vm215_vm6, %v300_v19 }
 0x49c   :  { %v2699_v21 = vpop.eup %2698  ;;  %2532 = vmatpush3.msra.mxu1 %v468_v20  ;;  %2533 = vmatprep.mubr.msk.f32.mxu1 %vm2803_vm5, %v2802_v49 }
 0x49d   :  { %v466_v22 = vmul.f32 %v2699_v21, %v2695_v14  ;;  %2541 = vmatprep.subr.mxu1 %v2802_v49 }
 0x49f   :  { %2534 = vmatmul.mubr.msk.f32.vlgmr.msra.gmra.mxu1 %vm215_vm6, %v466_v22 }
 0x4a0   :  { %2543 = vmatprep.mubr.msk.f32.mxu1 %vm2803_vm5, %v2802_v49  ;;  %2542 = vmatpush3.msra.mxu1 %v2972_v23 }
 0x4a1   :  { %2551 = vmatprep.subr.mxu1 %v2802_v49 }
 0x55b   :  { %v373_v25 = vpop.f32.mrf.mxu1 }
 0x55c   :  { %2544 = vmatmul.mubr.msk.f32.vlgmr.msra.gmra.mxu1 %vm215_vm6, %v373_v25 }
 0x55d   :  { %v2525_v27 = vpop.f32.mrf.mxu1  ;;  %2553 = vmatprep.mubr.msk.f32.mxu1 %vm2803_vm5, %v2802_v49 }
 0x55f   :  { %v539_v28 = vpop.f32.mrf.mxu1 }
 0x560   :  { %2539 = vmatmul.mubr.msk.f32.vlgmr.msra.gmra.mxu0 %vm215_vm6, %v539_v28 }
 0x561   :  { %2547 = vmatpush3.xpose.msk.msra.mxu0 %vm215_vm6, %v693_v26  ;;  %v2535_v29 = vpop.f32.mrf.mxu1  ;;  %2548 = vmatprep.mubr.msk.f32.mxu0 %vm2803_vm5, %v2802_v49 }
 0x562   :  { %2556 = vmatprep.subr.mxu0 %v2802_v49 }
 0x564   :  { %2549 = vmatmul.mubr.msk.f32.vlgmr.msra.gmra.mxu0 %vm215_vm6, %v691_v30 }
 0x565   :  { %2558 = vmatprep.mubr.msk.f32.mxu0 %vm2803_vm5, %v2802_v49  ;;  %2557 = vmatpush3.msra.mxu0 %v3019_v56 }
 0x566   :  { %2566 = vmatprep.subr.mxu0 %v2802_v49 }
 0x61c   :  { %v686_v31 = vpop.f32.mrf.mxu1 }
 0x61e   :  { %v2545_v33 = vpop.f32.mrf.mxu1 }
 0x620   :  { %v613_v34 = vpop.f32.mrf.mxu0 }
 0x621   :  { %v2994_v35 = vadd.f32 %v686_v31, %v613_v34 }
 0x622   :  { %v2540_v36 = vpop.f32.mrf.mxu0 }
 0x624   :  { %v764_v38 = vpop.f32.mrf.mxu0 }
 0x625   :  { %v765_v39 = vadd.f32 %v764_v38, %v2945_v58 }
 0x626   :  { %v2550_v40 = vpop.f32.mrf.mxu0 }
 0x627   :  { %v768_v41 = vsel %vm215_vm6, %v765_v39, -inf }
 0x628   :  { %769 = vmax.xlane.f32.xlu1 %v768_v41 }
 0x639   :  { %932 = vrot.lane.b32.xlu1 %v2926_v54, %s2811_s20 }
 0x63d   :  { %930 = vrot.lane.b32.xlu1 %v2926_v54, %s2812_s0 }
 0x641   :  { %1174 = vrot.lane.b32.xlu1 %v2924_v52, %s2805_s30 }
 0x6b1   :  { %v770_v42 = vpop.xlane.xlu1 %769 }
 0x6b2   :  { %v771_v43 = vsub.f32 %v765_v39, %v770_v42 }
 0x6b4   :  { %v772_v44 = vmul.f32 1.442695, %v771_v43 }
 0x6b5   :  { %v933_v51 = vpop.permute.xlu1 %932 }
 0x6b6   :  { %2700 = vpow2.f32 %v772_v44 }
 0x6b9   :  { %v931_v55 = vpop.permute.xlu1 %930 }
 0x6bd   :  { %v1175_v9 = vpop.permute.xlu1 %1174 }
 0x6c3   :  { %v2701_v45 = vpop.eup %2700 }
 0x6c4   :  { %v774_v46 = vsel %vm215_vm6, %v2701_v45, 0.0 }
 0x6c5   :  { %775 = vadd.xlane.f32.xlu0 %v774_v46 }
 0x6db   :  { %779 = vrot.lane.b32.xlu0 %v2926_v54, %s2813_s1 }
 0x74e   :  { %v776_v47 = vpop.xlane.xlu0 %775 }
 0x74f   :  { %2702 = vrcp.f32 %v776_v47 }
 0x752   :  { %v780_v48 = vpop.permute.xlu0 %779 }
 0x753   :  { %2552 = vmatpush3.msra.mxu1 %v780_v48 }
 0x754   :  { %2561 = vmatprep.subr.mxu1 %v2802_v49 }
 0x75c   :  { %v2703_v50 = vpop.eup %2702 }
 0x75d   :  { %v778_v53 = vmul.f32 %v2703_v50, %v2701_v45 }
 0x75f   :  { %2554 = vmatmul.mubr.msk.f32.vlgmr.msra.gmra.mxu1 %vm215_vm6, %v778_v53 }
 0x760   :  { %2562 = vmatpush3.xpose.msk.msra.mxu1 %vm215_vm6, %v933_v51  ;;  %2563 = vmatprep.mubr.msk.f32.mxu1 %vm2803_vm5, %v2802_v49 }
 0x761   :  { %2571 = vmatprep.subr.mxu1 %v2802_v49 }
 0x763   :  { %2564 = vmatmul.mubr.msk.f32.vlgmr.msra.gmra.mxu1 %vm215_vm6, %v931_v55 }
 0x764   :  { %2573 = vmatprep.mubr.msk.f32.mxu1 %vm2803_vm5, %v2802_v49  ;;  %2572 = vmatpush3.msra.mxu1 %v3056_v15 }
 0x765   :  { %2581 = vmatprep.subr.mxu1 %v2802_v49 }
 0x81f   :  { %v851_v57 = vpop.f32.mrf.mxu1 }
 0x820   :  { %2559 = vmatmul.mubr.msk.f32.vlgmr.msra.gmra.mxu0 %vm215_vm6, %v851_v57 }
 0x821   :  { %v2555_v59 = vpop.f32.mrf.mxu1  ;;  %2568 = vmatprep.mubr.msk.f32.mxu0 %vm2803_vm5, %v2802_v49 }
 0x823   :  { %v1004_v60 = vpop.f32.mrf.mxu1 }
 0x824   :  { %v1005_v61 = vadd.f32 %v1004_v60, %v2945_v58 }
 0x825   :  { %v2565_v62 = vpop.f32.mrf.mxu1 }
 0x826   :  { %v1008_v63 = vsel %vm215_vm6, %v1005_v61, -inf }
 0x827   :  { %1009 = vmax.xlane.f32.xlu0 %v1008_v63 }
 0x83d   :  { %1019 = vrot.lane.b32.xlu0 %v2926_v54, %s2814_s23 }
 0x841   :  { %1339 = vrot.lane.b32.xlu0 %v2924_v52, %s2804_s29 }
 0x8b0   :  { %v1010_v2 = vpop.xlane.xlu0 %1009 }
 0x8b1   :  { %v1011_v3 = vsub.f32 %v1005_v61, %v1010_v2 }
 0x8b3   :  { %v1012_v4 = vmul.f32 1.442695, %v1011_v3 }
 0x8b4   :  { %v1020_v5 = vpop.permute.xlu0 %1019 }
 0x8b5   :  { %2704 = vpow2.f32 %v1012_v4  ;;  %2567 = vmatpush3.msra.mxu0 %v1020_v5 }
 0x8b6   :  { %2576 = vmatprep.subr.mxu0 %v2802_v49 }
 0x8b8   :  { %v1340_v13 = vpop.permute.xlu0 %1339 }
 0x8c2   :  { %v2705_v58 = vpop.eup %2704 }
 0x8c3   :  { %v1014_v6 = vsel %vm215_vm6, %v2705_v58, 0.0 }
 0x8c4   :  { %1015 = vadd.xlane.f32.xlu1 %v1014_v6 }
 0x8d5   :  { %1337 = vrot.lane.b32.xlu1 %v2924_v52, %s2806_s10 }
 0x8e0   :  { %v925_v7 = vpop.f32.mrf.mxu0 }
 0x8e1   :  { %v929_v54 = vadd.f32 %v925_v7, %v2994_v35 }
 0x8e2   :  { %v2560_v8 = vpop.f32.mrf.mxu0 }
 0x94d   :  { %v1016_v10 = vpop.xlane.xlu1 %1015 }
 0x94e   :  { %2706 = vrcp.f32 %v1016_v10 }
 0x951   :  { %v1338_v14 = vpop.permute.xlu1 %1337 }
 0x95b   :  { %v2707_v11 = vpop.eup %2706 }
 0x95c   :  { %v1018_v12 = vmul.f32 %v2707_v11, %v2705_v58 }
 0x95e   :  { %2569 = vmatmul.mubr.msk.f32.vlgmr.msra.gmra.mxu0 %vm215_vm6, %v1018_v12 }
 0x95f   :  { %2577 = vmatpush3.xpose.msk.msra.mxu0 %vm215_vm6, %v1175_v9  ;;  %2578 = vmatprep.mubr.msk.f32.mxu0 %vm2803_vm5, %v2802_v49 }
 0x960   :  { %2586 = vmatprep.subr.mxu0 %v2802_v49 }
 0x962   :  { %2579 = vmatmul.mubr.msk.f32.vlgmr.msra.gmra.mxu0 %vm215_vm6, %v2924_v52 }
 0x963   :  { %2587 = vmatpush3.xpose.msk.msra.mxu0 %vm215_vm6, %v1340_v13  ;;  %2588 = vmatprep.mubr.msk.f32.mxu0 %vm2803_vm5, %v2802_v49 }
 0x964   :  { %2596 = vmatprep.subr.mxu0 %v2802_v49 }
 0x966   :  { %2589 = vmatmul.mubr.msk.f32.vlgmr.msra.gmra.mxu0 %vm215_vm6, %v1338_v14 }
 0x967   :  { %2597 = vmatpush3.msra.mxu0 %v2978_v24  ;;  %2598 = vmatprep.mubr.msk.f32.mxu0 %vm2803_vm5, %v2802_v49 }
 0x968   :  { %2606 = vmatprep.subr.mxu0 %v2802_v49 }
 0xa1e   :  { %v1091_v16 = vpop.f32.mrf.mxu0 }
 0xa1f   :  { %2574 = vmatmul.mubr.msk.f32.vlgmr.msra.gmra.mxu1 %vm215_vm6, %v1091_v16 }
 0xa20   :  { %v2570_v17 = vpop.f32.mrf.mxu0  ;;  %2583 = vmatprep.mubr.msk.f32.mxu1 %vm2803_vm5, %v2802_v49 }
 0xa21   :  { %v2129_v17 = vsub.s32 4, %v2902_v32 }
 0xa22   :  { %v1246_v19 = vpop.f32.mrf.mxu0 }
 0xa23   :  { %v1247_v20 = vadd.f32 %v1246_v19, %v3061_v18 }
 0xa24   :  { %v2580_v21 = vpop.f32.mrf.mxu0 }
 0xa25   :  { %v1250_v22 = vsel %vm215_vm6, %v1247_v20, -inf }
 0xa26   :  { %1251 = vmax.xlane.f32.xlu0 %v1250_v22  ;;  %v1411_v24 = vpop.f32.mrf.mxu0  ;;  %v2130_v22 = vrot.slane %v2908_v37, %v2129_v17  ;;  %v2285_v17 = vld [vmem:[%s3214_s7 + $0x30] sm:$0xff] }
 0xa27   :  { %v1412_v25 = vadd.f32 %v1411_v24, %v3061_v18 }
 0xa28   :  { %v2590_v26 = vpop.f32.mrf.mxu0 }
 0xa29   :  { %v1415_v27 = vsel %vm215_vm6, %v1412_v25, -inf }
 0xa2a   :  { %1416 = vmax.xlane.f32.xlu1 %v1415_v27 }
 0xa3b   :  { %1426 = vrot.lane.b32.xlu1 %v2924_v52, %s2810_s15 }
 0xa3f   :  { %1650 = vrot.lane.b32.xlu1 %v2924_v52, %s2808_s11 }
 0xa43   :  { %1648 = vrot.lane.b32.xlu1 %v2924_v52, %s2809_s14 }
 0xaaf   :  { %v1252_v28 = vpop.xlane.xlu0 %1251 }
 0xab0   :  { %v1253_v29 = vsub.f32 %v1247_v20, %v1252_v28 }
 0xab2   :  { %v1254_v30 = vmul.f32 1.442695, %v1253_v29 }
 0xab3   :  { %v1417_v31 = vpop.xlane.xlu1 %1416 }
 0xab4   :  { %2708 = vpow2.f32 %v1254_v30  ;;  %v1418_v33 = vsub.f32 %v1412_v25, %v1417_v31 }
 0xab6   :  { %v1419_v34 = vmul.f32 1.442695, %v1418_v33 }
 0xab7   :  { %v1427_v48 = vpop.permute.xlu1 %1426 }
 0xab8   :  { %2710 = vpow2.f32 %v1419_v34 }
 0xabb   :  { %v1651_v55 = vpop.permute.xlu1 %1650 }
 0xac1   :  { %v2709_v35 = vpop.eup %2708 }
 0xac2   :  { %v1256_v36 = vsel %vm215_vm6, %v2709_v35, 0.0 }
 0xac3   :  { %1257 = vadd.xlane.f32.xlu0 %v1256_v36 }
 0xac5   :  { %v2711_v38 = vpop.eup %2710 }
 0xac6   :  { %v1421_v39 = vsel %vm215_vm6, %v2711_v38, 0.0 }
 0xac7   :  { %1422 = vadd.xlane.f32.xlu0 %v1421_v39 }
 0xadd   :  { %1261 = vrot.lane.b32.xlu0 %v2924_v52, %s2807_s3 }
 0xadf   :  { %v1165_v40 = vpop.f32.mrf.mxu1 }
 0xae0   :  { %v3079_v41 = vadd.f32 %v1165_v40, %v929_v54 }
 0xae1   :  { %v2575_v42 = vpop.f32.mrf.mxu1 }
 0xae2   :  { %v1170_v21 = vadd.f32 %v3079_v41, %v2878_v0 }
 0xae4   :  { %v3131_v26 = vadd.f32 %v2130_v22, %v1170_v21 }
 0xae6   :  { %v2133_v28 = vsel %vm64_vm0, %v3131_v26, 0.0 }
 0xb4c   :  { %v1258_v43 = vpop.xlane.xlu0 %1257 }
 0xb4d   :  { %2712 = vrcp.f32 %v1258_v43 }
 0xb50   :  { %v1423_v44 = vpop.xlane.xlu0 %1422 }
 0xb51   :  { %2714 = vrcp.f32 %v1423_v44 }
 0xb54   :  { %v1262_v45 = vpop.permute.xlu0 %1261 }
 0xb55   :  { %2582 = vmatpush3.msra.mxu1 %v1262_v45 }
 0xb56   :  { %2591 = vmatprep.subr.mxu1 %v2802_v49 }
 0xb5a   :  { %v2713_v46 = vpop.eup %2712 }
 0xb5b   :  { %v1260_v47 = vmul.f32 %v2713_v46, %v2709_v35 }
 0xb5d   :  { %2584 = vmatmul.mubr.msk.f32.vlgmr.msra.gmra.mxu1 %vm215_vm6, %v1260_v47 }
 0xb5e   :  { %v2715_v50 = vpop.eup %2714  ;;  %2592 = vmatpush3.msra.mxu1 %v1427_v48  ;;  %2593 = vmatprep.mubr.msk.f32.mxu1 %vm2803_vm5, %v2802_v49 }
 0xb5f   :  { %v1425_v51 = vmul.f32 %v2715_v50, %v2711_v38  ;;  %2601 = vmatprep.subr.mxu1 %v2802_v49 }
 0xb61   :  { %2594 = vmatmul.mubr.msk.f32.vlgmr.msra.gmra.mxu1 %vm215_vm6, %v1425_v51 }
 0xb62   :  { %2602 = vmatpush3.msra.mxu1 %v2972_v23  ;;  %2603 = vmatprep.mubr.msk.f32.mxu1 %vm2803_vm5, %v2802_v49  ;;  %v1649_v23 = vpop.permute.xlu1 %1648 }
 0xb63   :  { %2611 = vmatprep.subr.mxu1 %v2802_v49 }
 0xc1d   :  { %v1333_v53 = vpop.f32.mrf.mxu1 }
 0xc1e   :  { %2604 = vmatmul.mubr.msk.f32.vlgmr.msra.gmra.mxu1 %vm215_vm6, %v1333_v53 }
 0xc1f   :  { %v2585_v57 = vpop.f32.mrf.mxu1  ;;  %2613 = vmatprep.mubr.msk.f32.mxu1 %vm2803_vm5, %v2802_v49 }
 0xc21   :  { %v1498_v59 = vpop.f32.mrf.mxu1 }
 0xc22   :  { %2599 = vmatmul.mubr.msk.f32.vlgmr.msra.gmra.mxu0 %vm215_vm6, %v1498_v59 }
 0xc23   :  { %2607 = vmatpush3.xpose.msk.msra.mxu0 %vm215_vm6, %v1651_v55  ;;  %v2595_v60 = vpop.f32.mrf.mxu1  ;;  %2608 = vmatprep.mubr.msk.f32.mxu0 %vm2803_vm5, %v2802_v49 }
 0xc24   :  { %2616 = vmatprep.subr.mxu0 %v2802_v49 }
 0xc26   :  { %2609 = vmatmul.mubr.msk.f32.vlgmr.msra.gmra.mxu0 %vm215_vm6, %v1649_v23 }
 0xc27   :  { %2617 = vmatpush3.msra.mxu0 %v3019_v56  ;;  %2618 = vmatprep.mubr.msk.f32.mxu0 %vm2803_vm5, %v2802_v49 }
 0xc28   :  { %2626 = vmatprep.subr.mxu0 %v2802_v49 }
 0xcde   :  { %v1644_v61 = vpop.f32.mrf.mxu1 }
 0xce0   :  { %v2605_v62 = vpop.f32.mrf.mxu1 }
 0xce2   :  { %v1571_v63 = vpop.f32.mrf.mxu0 }
 0xce3   :  { %v1645_v2 = vadd.f32 %v1644_v61, %v1571_v63 }
 0xce4   :  { %v2600_v3 = vpop.f32.mrf.mxu0 }
 0xce6   :  { %v1722_v4 = vpop.f32.mrf.mxu0 }
 0xce7   :  { %v1723_v5 = vadd.f32 %v1722_v4, %v3061_v18 }
 0xce8   :  { %v2610_v58 = vpop.f32.mrf.mxu0 }
 0xce9   :  { %v1726_v6 = vsel %vm215_vm6, %v1723_v5, -inf  ;;  %v2173_v58 = vsub.s32 2, %v2902_v32 }
 0xcea   :  { %1727 = vmax.xlane.f32.xlu0 %v1726_v6 }
 0xceb   :  { %v2174_v6 = vrot.slane %v2908_v37, %v2173_v58 }
 0xd00   :  { %1737 = vrot.lane.b32.xlu0 %v2924_v52, %s2813_s1 }
 0xd04   :  { %1887 = vrot.lane.b32.xlu0 %v2924_v52, %s2812_s0 }
 0xd73   :  { %v1728_v56 = vpop.xlane.xlu0 %1727 }
 0xd74   :  { %v1729_v7 = vsub.f32 %v1723_v5, %v1728_v56  ;;  %v2181_v56 = vsub.s32 3, %v2902_v32 }
 0xd76   :  { %v1730_v54 = vmul.f32 1.442695, %v1729_v7 }
 0xd77   :  { %v1738_v8 = vpop.permute.xlu0 %1737 }
 0xd78   :  { %2716 = vpow2.f32 %v1730_v54  ;;  %2612 = vmatpush3.msra.mxu1 %v1738_v8  ;;  %v2182_v54 = vrot.slane %v2908_v37, %v2181_v56 }
 0xd79   :  { %2621 = vmatprep.subr.mxu1 %v2802_v49 }
 0xd7b   :  { %v1888_v16 = vpop.permute.xlu0 %1887 }
 0xd85   :  { %v2717_v9 = vpop.eup %2716 }
 0xd86   :  { %v1732_v10 = vsel %vm215_vm6, %v2717_v9, 0.0 }
 0xd87   :  { %1733 = vadd.xlane.f32.xlu1 %v1732_v10  ;;  %v2188_v10 = vld [vmem:[%s3212_s5 + $0x18] sm:$0xff] }
 0xd98   :  { %1889 = vrot.lane.b32.xlu1 %v2924_v52, %s2811_s20 }
 0xe10   :  { %v1734_v11 = vpop.xlane.xlu1 %1733 }
 0xe11   :  { %2718 = vrcp.f32 %v1734_v11  ;;  %v2187_v11 = vld [vmem:[%s3212_s5 + $0x10] sm:$0xff] }
 0xe14   :  { %v1890_v14 = vpop.permute.xlu1 %1889 }
 0xe1e   :  { %v2719_v12 = vpop.eup %2718 }
 0xe1f   :  { %v1736_v13 = vmul.f32 %v2719_v12, %v2717_v9 }
 0xe21   :  { %2614 = vmatmul.mubr.msk.f32.vlgmr.msra.gmra.mxu1 %vm215_vm6, %v1736_v13  ;;  %v2186_v13 = vld [vmem:[%s3212_s5 + $0x8] sm:$0xff] }
 0xe22   :  { %2622 = vmatpush3.xpose.msk.msra.mxu1 %vm215_vm6, %v1890_v14  ;;  %2623 = vmatprep.mubr.msk.f32.mxu1 %vm2803_vm5, %v2802_v49  ;;  %v2185_v14 = vld [vmem:[%s3212_s5] sm:$0xff] }
 0xe23   :  { %2631 = vmatprep.subr.mxu1 %v2802_v49 }
 0xe25   :  { %2624 = vmatmul.mubr.msk.f32.vlgmr.msra.gmra.mxu1 %vm215_vm6, %v1888_v16  ;;  %v2286_v16 = vld [vmem:[%s3214_s7 + $0x38] sm:$0xff] }
 0xe26   :  { %2632 = vmatpush3.msra.mxu1 %v3056_v15  ;;  %2633 = vmatprep.mubr.msk.f32.mxu1 %vm2803_vm5, %v2802_v49 }
 0xe27   :  { %2647 = vmatprep.subr.mxu1 %v2286_v16 }
 0xee1   :  { %v1809_v19 = vpop.f32.mrf.mxu1 }
 0xee2   :  { %2619 = vmatmul.mubr.msk.f32.vlgmr.msra.gmra.mxu0 %vm215_vm6, %v1809_v19  ;;  %v2284_v19 = vld [vmem:[%s3214_s7 + $0x28] sm:$0xff] }
 0xee3   :  { %v2615_v20 = vpop.f32.mrf.mxu1  ;;  %2628 = vmatprep.mubr.msk.f32.mxu0 %vm2803_vm5, %v2802_v49 }
 0xee4   :  { %v2283_v20 = vld [vmem:[%s3214_s7 + $0x20] sm:$0xff] }
 0xee5   :  { %v1961_v24 = vpop.f32.mrf.mxu1 }
 0xee6   :  { %v1962_v15 = vadd.f32 %v1961_v24, %v3061_v18 }
 0xee7   :  { %v2625_v25 = vpop.f32.mrf.mxu1 }
 0xee8   :  { %v1965_v27 = vsel %vm215_vm6, %v1962_v15, -inf }
 0xee9   :  { %1966 = vmax.xlane.f32.xlu1 %v1965_v27 }
 0xeed   :  { %2134 = vadd.xlane.f32.xlu1 %v2133_v28 }
 0xf72   :  { %v1967_v29 = vpop.xlane.xlu1 %1966 }
 0xf73   :  { %v1968_v49 = vsub.f32 %v1962_v15, %v1967_v29 }
 0xf75   :  { %v1969_v30 = vmul.f32 1.442695, %v1968_v49 }
 0xf76   :  { %v2135_v42 = vpop.xlane.xlu1 %2134 }
 0xf77   :  { %2720 = vpow2.f32 %v1969_v30  ;;  %v2139_v43 = vmul.f32 0.03125, %v2135_v42 }
 0xf79   :  { %v2141_v46 = vsub.f32 %v3131_v26, %v2139_v43 }
 0xf7b   :  { %v2143_v51 = vmul.f32 %v2141_v46, %v2141_v46  ;;  %v2175_v7 = vmul.f32 %v2174_v6, %v2141_v46 }
 0xf7d   :  { %v2145_v53 = vsel %vm64_vm0, %v2143_v51, 0.0 }
 0xf84   :  { %v2721_v0 = vpop.eup %2720 }
 0xf85   :  { %v1971_v31 = vsel %vm215_vm6, %v2721_v0, 0.0 }
 0xf86   :  { %1972 = vadd.xlane.f32.xlu0 %v1971_v31 }
 0xf9c   :  { %1976 = vrot.lane.b32.xlu0 %v2924_v52, %s2814_s23 }
 0xfa2   :  { %v1882_v18 = vpop.f32.mrf.mxu0 }
 0xfa3   :  { %v1886_v33 = vadd.f32 %v1882_v18, %v1645_v2  ;;  %v2282_v18 = vld [vmem:[%s3214_s7 + $0x18] sm:$0xff] }
 0xfa4   :  { %v2620_v34 = vpop.f32.mrf.mxu0 }
 0xfa5   :  { %v2280_v34 = vld [vmem:[%s3214_s7 + $0x8] sm:$0xff] }
0x100f   :  { %v1973_v35 = vpop.xlane.xlu0 %1972 }
0x1010   :  { %2722 = vrcp.f32 %v1973_v35  ;;  %v2279_v35 = vld [vmem:[%s3214_s7] sm:$0xff] }
0x1013   :  { %v1977_v36 = vpop.permute.xlu0 %1976 }
0x1014   :  { %2627 = vmatpush3.msra.mxu0 %v1977_v36  ;;  %v2430_v36 = vld [vmem:[%s3213_s6] ss:$0 sm:$0xff] }
0x1015   :  { %2636 = vmatprep.subr.mxu0 %v2188_v10 }
0x101d   :  { %v2723_v38 = vpop.eup %2722 }
0x101e   :  { %v1975_v39 = vmul.f32 %v2723_v38, %v2721_v0 }
0x1020   :  { %2629 = vmatmul.mubr.msk.f32.vlgmr.msra.gmra.mxu0 %vm215_vm6, %v1975_v39 }
0x1021   :  { %2637 = vmatpush3.msra.mxu0 %v2188_v10 }
0x1022   :  { %2638 = vmatprep.subr.mxu0 %v2187_v11 }
0x1023   :  { %2639 = vmatpush3.msra.mxu0 %v2187_v11 }
0x1024   :  { %2640 = vmatprep.subr.mxu0 %v2186_v13 }
0x1025   :  { %2641 = vmatpush3.msra.mxu0 %v2186_v13 }
0x1026   :  { %2642 = vmatprep.subr.mxu0 %v2185_v14 }
0x1027   :  { %2643 = vmatpush3.msra.mxu0 %v2185_v14 }
0x10e0   :  { %v2048_v40 = vpop.f32.mrf.mxu0 }
0x10e1   :  { %2634 = vmatmul.mubr.msk.f32.vlgmr.msra.gmra.mxu1 %vm215_vm6, %v2048_v40 }
0x10e2   :  { %v2630_v41 = vpop.f32.mrf.mxu0  ;;  %2648 = vmatpush3.msra.mxu1 %v2286_v16 }
0x10e3   :  { %2649 = vmatprep.subr.mxu1 %v2285_v17 }
0x10e4   :  { %2650 = vmatpush3.msra.mxu1 %v2285_v17 }
0x10e5   :  { %2651 = vmatprep.subr.mxu1 %v2284_v19 }
0x10e6   :  { %2652 = vmatpush3.msra.mxu1 %v2284_v19 }
0x10e7   :  { %2653 = vmatprep.subr.mxu1 %v2283_v20 }
0x10e8   :  { %2654 = vmatpush3.msra.mxu1 %v2283_v20 }
0x10e9   :  { %2655 = vmatprep.subr.mxu1 %v2282_v18 }
0x10ea   :  { %2656 = vmatpush3.msra.mxu1 %v2282_v18 }
0x11a1   :  { %v2121_v44 = vpop.f32.mrf.mxu1 }
0x11a2   :  { %v2125_v45 = vadd.f32 %v2121_v44, %v1886_v33  ;;  %v2281_v33 = vld [vmem:[%s3214_s7 + $0x10] sm:$0xff]  ;;  %v2289_v44 = vsub.s32 5, %v2902_v32  ;;  %s2815_s7 = smov [#allocation7]  }
0x11a3   :  { %v2635_v52 = vpop.f32.mrf.mxu1  ;;  %2657 = vmatprep.subr.mxu1 %v2281_v33  ;;  %s2382_s4 = sshll.u32 %s2815_s7, 4  ;;  %s2383_s4 = int_to_ptr.vmem [resolvable:$true] %s2382_s4 }
0x11a4   :  { %v2126_v47 = vadd.f32 %v2125_v45, %v2880_v1  ;;  %2658 = vmatpush3.msra.mxu1 %v2281_v33  ;;  %v2290_v45 = vrot.slane %v2908_v37, %v2289_v44  ;;  %s2772_s6 = scalar_lea.vmem %s2383_s4, 256  ;;  %p2777_p11 = scmp.lt.s32.totalorder %s2383_s4, %s2383_s4 }
0x11a5   :  { %2659 = vmatprep.subr.mxu1 %v2280_v34  ;;  %p2773_p10 = scmp.ne.s32.totalorder %s2383_s4, %s2772_s6  ;;  %p2778_p12 = scmp.lt.s32.totalorder %s2772_s6, %s2772_s6 }
0x11a6   :  { %v3143_v48 = vadd.f32 %v2130_v22, %v2126_v47  ;;  %2660 = vmatpush3.msra.mxu1 %v2280_v34 }
0x11a7   :  { %2661 = vmatprep.subr.mxu1 %v2279_v35  ;;  %p2779_p13 = por %p2778_p12, %p2777_p11 }
0x11a8   :  { %v2136_v50 = vsel %vm64_vm0, %v3143_v48, 0.0  ;;  %2662 = vmatpush3.msra.mxu1 %v2279_v35 }
0x11a9   :  { %2137 = vadd.xlane.f32.xlu1 %v2136_v50  ;;  %p2780_p0 = pnand %p2779_p13, %p2773_p10 }
0x11ad   :  { %2146 = vadd.xlane.f32.xlu1 %v2145_v53 }
0x1232   :  { %v2138_v55 = vpop.xlane.xlu1 %2137 }
0x1233   :  { %v2140_v57 = vmul.f32 0.03125, %v2138_v55 }
0x1235   :  { %v2142_v59 = vsub.f32 %v3143_v48, %v2140_v57 }
0x1236   :  { %v2147_v60 = vpop.xlane.xlu1 %2146 }
0x1237   :  { %v2151_v23 = vmul.f32 0.032258064, %v2147_v60  ;;  %v2144_v61 = vmul.f32 %v2142_v59, %v2142_v59  ;;  %v2176_v49 = vmul.f32 %v2174_v6, %v2142_v59 }
0x1239   :  { %2724 = vrsqrt.f32 %v2151_v23  ;;  %v2148_v1 = vsel %vm64_vm0, %v2144_v61, 0.0  ;;  %vm2155_vm7 = vcmp.eq.f32.partialorder %v2151_v23, inf  ;;  %v2158_v2 = vand.u32 2147483648, %v2151_v23 }
0x123a   :  { %2149 = vadd.xlane.f32.xlu1 %v2148_v1  ;;  %vm2157_vm8 = vcmp.eq.f32.partialorder %v2151_v23, 0.0 }
0x1246   :  { %v2725_v62 = vpop.eup %2724 }
0x1247   :  { %v2154_v63 = vmul.f32 %v2725_v62, %v2151_v23 }
0x1249   :  { %v2156_v3 = vsel %vm2155_vm7, %v2151_v23, %v2154_v63 }
0x124a   :  { %v2159_v4 = vsel %vm2157_vm8, %v2158_v2, %v2156_v3 }
0x124b   :  { %v2167_v5 = vadd.f32 1e-06, %v2159_v4 }
0x124d   :  { %2726 = vrcp.f32 %v2167_v5 }
0x125a   :  { %v2727_v8 = vpop.eup %2726 }
0x125b   :  { %v2177_v9 = vmul.f32 %v2727_v8, %v2175_v7 }
0x125d   :  { %v2183_v12 = vadd.f32 %v2182_v54, %v2177_v9 }
0x125f   :  { %2644 = vmatprep.mubr.msk.f32.mxu0 %vm64_vm0, %v2183_v12 }
0x12c3   :  { %v2150_v21 = vpop.xlane.xlu1 %2149 }
0x12c4   :  { %v2152_v22 = vmul.f32 0.032258064, %v2150_v21 }
0x12c6   :  { %2728 = vrsqrt.f32 %v2152_v22  ;;  %vm2162_vm9 = vcmp.eq.f32.partialorder %v2152_v22, inf  ;;  %v2165_v25 = vand.u32 2147483648, %v2152_v22  ;;  %vm2164_vm10 = vcmp.eq.f32.partialorder %v2152_v22, 0.0 }
0x12d3   :  { %v2729_v24 = vpop.eup %2728 }
0x12d4   :  { %v2161_v15 = vmul.f32 %v2729_v24, %v2152_v22 }
0x12d6   :  { %v2163_v27 = vsel %vm2162_vm9, %v2152_v22, %v2161_v15 }
0x12d7   :  { %v2166_v28 = vsel %vm2164_vm10, %v2165_v25, %v2163_v27 }
0x12d8   :  { %v2168_v29 = vadd.f32 1e-06, %v2166_v28 }
0x12da   :  { %2730 = vrcp.f32 %v2168_v29 }
0x12e7   :  { %v2731_v30 = vpop.eup %2730 }
0x12e8   :  { %v2178_v0 = vmul.f32 %v2731_v30, %v2176_v49 }
0x12ea   :  { %v2184_v31 = vadd.f32 %v2182_v54, %v2178_v0 }
0x12ec   :  { %2645 = vmatmul.mubr.msk.f32.vlgmr.msra.gmra.mxu0 %vm64_vm0, %v2184_v31 }
0x13ac   :  { %v2646_v38 = vpop.f32.mrf.mxu0 }
0x13ad   :  { %v2274_v39 = vadd.f32 %v2646_v38, %v2430_v36 }
0x13ae   :  { %v2268_v40 = vpop.f32.mrf.mxu0 }
0x13af   :  { %v2269_v41 = vadd.f32 %v2430_v36, %v2268_v40  ;;  %v2278_v43 = vmax.f32 %v2274_v39, 0.0 }
0x13b1   :  { %v2277_v42 = vmax.f32 %v2269_v41, 0.0 }
0x13b3   :  { %2663 = vmatprep.mubr.msk.f32.mxu1 %vm2291_vm11, %v2277_v42 }
0x13b4   :  { %2664 = vmatmul.mubr.msk.f32.vlgmr.msra.gmra.mxu1 %vm2291_vm11, %v2278_v43 }
0x1474   :  { %v2665_v52 = vpop.f32.mrf.mxu1 }
0x1475   :  { %v2370_v46 = vadd.f32 %v2665_v52, %v2290_v45 }
0x1476   :  { %v2364_v47 = vpop.f32.mrf.mxu1 }
0x1477   :  { %v2374_v50 = vadd.f32 %v2370_v46, %v3143_v48  ;;  %v2365_v51 = vadd.f32 %v2364_v47, %v2290_v45 }
0x1479   :  { %2376 = vst.msk [vmem:[#allocation7 + $0x8] sm:$0xff] %vm64_vm0, %v2374_v50  ;;  %v2373_v53 = vadd.f32 %v2365_v51, %v3131_v26 }
0x147b   :  { %2375 = vst.msk [vmem:[#allocation7] sm:$0xff] %vm64_vm0, %v2373_v53 }
0x147c   :  { %2783 = shalt.err (!%p2780_p0)
}
0x147d   :  { %2388 = dma.vmem_to_hbm [thread:$0]  %s2383_s4, 256, %s3216_s9, [#allocation4], %s2799_s12, %s2799_s12, %s2800_s13  }
0x147e   :  { %2796 = dma.done.wait [#allocation4], 256  }
0x147f   :  { %2797 = vsyncadd [#allocation4], 4294967040 }
0x1480   :  { %2392 = vsyncpa [#allocation3], 1 }
0x1481   :  { %2393 = vsyncpa [#allocation6], 1 }
0x1482   :  { %2394 = vsyncpa [#allocation4], 1 }

</bundles_post_ra>
